<compile_context>
chip_gen: v7x
topology: tpu7x:2x2x1
jax: 0.10.0
libtpu: 0.0.40
codegen_flags: <defaults>
</compile_context>

<pallas_src>
import jax
import jax.numpy as jnp
from jax.experimental import pallas as pl
from jax.experimental.pallas import tpu as pltpu

EPS = 1e-5  # torch.nn.LayerNorm default eps


def _layernorm_tanh(h, gamma, beta):
    # LayerNorm over last dim (biased variance, like torch), then Tanh. f32 math.
    mean = jnp.mean(h, axis=-1, keepdims=True)
    var = jnp.mean((h - mean) ** 2, axis=-1, keepdims=True)
    y = (h - mean) * jax.lax.rsqrt(var + EPS)
    return jnp.tanh(y * gamma + beta)


def node_network_kernel(x_ref, a_ref, vp_ref, w1abc_ref, w1d_ref, wr_ref,
                        ln_ref, out_ref):
    Bt, N, D_in = x_ref.shape
    D_out = out_ref.shape[2]
    rows = Bt * N

    x = x_ref[...]                      # (Bt, N, D_in)   matmul dtype
    a = a_ref[...]                      # (Bt, N, N)      matmul dtype
    cdt = x.dtype

    # ----- neighbor aggregation: A read once, A^T via in-kernel transpose -----
    a_t = jnp.swapaxes(a, 1, 2)         # per-graph (N,N) minor-dim transpose (XLU)
    mi = jnp.einsum("bij,bjd->bid", a_t, x,
                    preferred_element_type=jnp.float32)      # A^T @ x
    mo = jnp.einsum("bij,bjd->bid", a, x,
                    preferred_element_type=jnp.float32)      # A   @ x

    # ----- layer 1: merged K = 3*D_in matmul + per-graph rank-1 vp term -------
    hcat = jnp.concatenate(
        [mi.reshape(rows, D_in).astype(cdt),
         mo.reshape(rows, D_in).astype(cdt),
         x.reshape(rows, D_in)], axis=-1)                    # (rows, 3*D_in)
    ln1 = ln_ref[0]                                          # (3, D_out): [b, g, beta]
    h = jnp.dot(hcat, w1abc_ref[...],
                preferred_element_type=jnp.float32)          # (rows, D_out)
    vpf = vp_ref[...].reshape(Bt, D_in)                      # (Bt, D_in)
    vterm = (jnp.dot(vpf, w1d_ref[...], preferred_element_type=jnp.float32)
             + ln1[0:1, :])                                  # (Bt, D_out)
    h = (h.reshape(Bt, N, D_out) + vterm[:, None, :]).reshape(rows, D_out)
    h = _layernorm_tanh(h, ln1[1:2, :], ln1[2:3, :])

    # ----- layers 2..4 on flattened (Bt*N, D_out) rows -------------------------
    for k in range(3):
        lnk = ln_ref[k + 1]                                  # (3, D_out)
        h = jnp.dot(h.astype(wr_ref.dtype), wr_ref[k],
                    preferred_element_type=jnp.float32) + lnk[0:1, :]
        h = _layernorm_tanh(h, lnk[1:2, :], lnk[2:3, :])

    out_ref[...] = h.reshape(Bt, N, D_out).astype(out_ref.dtype)


def _round_up(v, m):
    return -(-v // m) * m


def _padded_bytes(rows, cols, itemsize):
    # (sublane, lane)-padded VMEM footprint of one 2-D slab.
    return _round_up(max(rows, 1), 8) * _round_up(max(cols, 1), 128) * itemsize


def _choose_block_b(B, N, D_in, D_out, in_itemsize, requested, vmem_budget_bytes):
    """Pick a batch block that fits the VMEM budget and keeps >=2 grid steps."""
    # I/O blocks are double-buffered by the BlockSpec pipeline; in-kernel live
    # intermediates (a_t, mi, mo, hcat, h, LN temps) are f32, 128-lane padded.
    io_per_graph = (_padded_bytes(N, D_in, in_itemsize)       # x
                    + _padded_bytes(N, N, in_itemsize)        # A
                    + _padded_bytes(N, D_out, 4))             # out (f32)
    live_per_graph = 6 * _padded_bytes(N, 128, 4)
    per_graph = 2 * io_per_graph + live_per_graph
    bb = max(1, min(requested, B))
    if B >= 2:                      # >=2 grid steps: feed both v7x TensorCores
        bb = min(bb, -(-B // 2))
    bb = max(1, min(bb, vmem_budget_bytes // per_graph))
    return bb, per_graph


def node_network(x, A, vp, params, *, block_b=128,
                 matmul_dtype=jnp.float32,
                 vmem_budget_bytes=24 * 1024 * 1024):
    """mi = A^T x, mo = A x, h = [mi,mo,x,vp]; 4 x (Linear -> LayerNorm -> Tanh)."""
    B, N, D_in = x.shape
    D_out = params["w4"].shape[1]

    # ---- pack parameters -----------------------------------------------------
    w1 = params["w1"].astype(matmul_dtype)                    # (4*D_in, D_out)
    w1abc = w1[: 3 * D_in]                                    # rows for [mi|mo|x]
    w1d = w1[3 * D_in:]                                       # rows for vp
    wr = jnp.stack([params["w2"], params["w3"],
                    params["w4"]]).astype(matmul_dtype)       # (3, D_out, D_out)
    ln = jnp.stack([
        jnp.stack([params[f"b{i}"].reshape(D_out),
                   params[f"g{i}"].reshape(D_out),
                   params[f"be{i}"].reshape(D_out)])
        for i in range(1, 5)]).astype(jnp.float32)            # (4, 3, D_out)

    xm = x.astype(matmul_dtype)
    am = A.astype(matmul_dtype)
    vpm = vp.astype(matmul_dtype).reshape(B, 1, D_in)         # trailing dims full

    # ---- batch-blocked grid (VMEM-budgeted, >=2 parallel steps) ---------------
    in_itemsize = jnp.dtype(matmul_dtype).itemsize
    bb, per_graph_bytes = _choose_block_b(
        B, N, D_in, D_out, in_itemsize, block_b, vmem_budget_bytes)
    n_blocks = pl.cdiv(B, bb)
    Bp = n_blocks * bb
    if Bp != B:
        pad = Bp - B               # zero graphs flow safely through LN + tanh
        xm = jnp.pad(xm, ((0, pad), (0, 0), (0, 0)))
        am = jnp.pad(am, ((0, pad), (0, 0), (0, 0)))
        vpm = jnp.pad(vpm, ((0, pad), (0, 0), (0, 0)))

    flops_per_graph = (2 * 2 * N * N * D_in                    # mi, mo aggregation
                       + 2 * N * (3 * D_in) * D_out            # merged layer 1
                       + 2 * D_in * D_out                      # vp rank-1 term
                       + 3 * 2 * N * D_out * D_out)            # layers 2..4
    bytes_accessed = ((xm.size + am.size + vpm.size
                       + w1abc.size + w1d.size + wr.size) * in_itemsize
                      + ln.size * 4 + Bp * N * D_out * 4)
    cost = pl.CostEstimate(
        flops=int(Bp * flops_per_graph),
        transcendentals=int(Bp * N * 4 * (D_out + 1)),
        bytes_accessed=int(bytes_accessed))

    # Explicit scoped-VMEM limit: >= 32 MiB (raises v5e's 16 MiB default),
    # capped at 48 MiB to leave headroom under v7x's 64 MiB physical VMEM.
    vmem_limit = int(min(48 * 1024 * 1024,
                         max(32 * 1024 * 1024,
                             bb * per_graph_bytes + (2 << 20))))

    out = pl.pallas_call(
        node_network_kernel,
        out_shape=jax.ShapeDtypeStruct((Bp, N, D_out), jnp.float32),
        grid=(n_blocks,),
        in_specs=[
            pl.BlockSpec((bb, N, D_in), lambda b: (b, 0, 0)),      # x
            pl.BlockSpec((bb, N, N), lambda b: (b, 0, 0)),         # A
            pl.BlockSpec((bb, 1, D_in), lambda b: (b, 0, 0)),      # vp
            pl.BlockSpec(w1abc.shape, lambda b: (0, 0)),           # W1 [mi|mo|x]
            pl.BlockSpec(w1d.shape, lambda b: (0, 0)),             # W1 [vp]
            pl.BlockSpec(wr.shape, lambda b: (0, 0, 0)),           # W2..W4
            pl.BlockSpec(ln.shape, lambda b: (0, 0, 0)),           # bias/gamma/beta
        ],
        out_specs=pl.BlockSpec((bb, N, D_out), lambda b: (b, 0, 0)),
        compiler_params=pltpu.CompilerParams(
            dimension_semantics=("parallel",),
            vmem_limit_bytes=vmem_limit),
        cost_estimate=cost,
    )(xm, am, vpm, w1abc, w1d, wr, ln)
    return out[:B]


def reference(x, A, vp, params, *, precision=None):
    mi = jnp.einsum("bji,bjd->bid", A, x, precision=precision)   # A^T @ x
    mo = jnp.einsum("bij,bjd->bid", A, x, precision=precision)   # A   @ x
    vpb = jnp.broadcast_to(vp[:, None, :], x.shape)
    h = jnp.concatenate([mi, mo, x, vpb], axis=-1)
    for i in range(1, 5):
        h = jnp.dot(h, params[f"w{i}"], precision=precision) + params[f"b{i}"]
        mean = h.mean(-1, keepdims=True)
        var = ((h - mean) ** 2).mean(-1, keepdims=True)
        h = jnp.tanh((h - mean) / jnp.sqrt(var + EPS)
                     * params[f"g{i}"] + params[f"be{i}"])
    return h


def init_params(key, input_dim, output_dim):
    """Deterministic synthetic parameters for make_mlp(input_dim*4, [output_dim]*4)."""
    sizes = [input_dim * 4] + [output_dim] * 4
    params = {}
    for i in range(1, 5):
        key, kw, kb = jax.random.split(key, 3)
        fan_in = sizes[i - 1]
        params[f"w{i}"] = (jax.random.normal(kw, (sizes[i - 1], sizes[i]),
                                             jnp.float32) / jnp.sqrt(fan_in))
        params[f"b{i}"] = 0.01 * jax.random.normal(kb, (1, sizes[i]), jnp.float32)
        params[f"g{i}"] = jnp.ones((1, sizes[i]), jnp.float32)    # LayerNorm weight
        params[f"be{i}"] = jnp.zeros((1, sizes[i]), jnp.float32)  # LayerNorm bias
    return params


if __name__ == "__main__":
    # B=7 with the auto-chosen block of 4 exercises batch padding and a 2-step
    # "parallel" grid (megacore sharding path).
    B, N, D_in, D_out = 7, 16, 8, 32

    key = jax.random.PRNGKey(0)
    kx, ka, kv, kp = jax.random.split(key, 4)
    x = jax.random.normal(kx, (B, N, D_in), jnp.float32)
    A = jax.random.uniform(ka, (B, N, N), jnp.float32)
    vp = jax.random.normal(kv, (B, D_in), jnp.float32)
    params = init_params(kp, D_in, D_out)

    # Default f32 matmul operands (PyTorch parity); pass matmul_dtype=jnp.bfloat16
    # on v6e/v7x for ~2x MXU throughput and half the DMA/VMEM at relaxed tolerance.
    out = node_network(x, A, vp, params)
    out = jax.block_until_ready(out)
    assert out.shape == (B, N, D_out)

    # Accept whichever f32 reference mode (true-f32 or default matmul precision)
    # the kernel's matmuls landed closest to.
    ref_hi = reference(x, A, vp, params, precision=jax.lax.Precision.HIGHEST)
    ref_lo = reference(x, A, vp, params)
    err = jnp.minimum(jnp.max(jnp.abs(out - ref_hi)),
                      jnp.max(jnp.abs(out - ref_lo)))
    assert err < 2e-3, f"max abs err {err}"

    print("KERNEL_OK")
</pallas_src>

<mosaic_0001>
module attributes {stable_mosaic.version = 11 : i64} {
  func.func @node_network_kernel(%arg0: i32, %arg1: memref<4x16x8xf32, #tpu.memory_space<vmem>>, %arg2: memref<4x16x16xf32, #tpu.memory_space<vmem>>, %arg3: memref<4x1x8xf32, #tpu.memory_space<vmem>>, %arg4: memref<24x32xf32, #tpu.memory_space<vmem>>, %arg5: memref<8x32xf32, #tpu.memory_space<vmem>>, %arg6: memref<3x32x32xf32, #tpu.memory_space<vmem>>, %arg7: memref<4x3x32xf32, #tpu.memory_space<vmem>>, %arg8: memref<4x16x32xf32, #tpu.memory_space<vmem>>) attributes {dimension_semantics = [#tpu.dimension_semantics<parallel>], iteration_bounds = array<i64: 2>, scalar_prefetch = 0 : i64, scratch_operands = 0 : i64, tpu.core_type = #tpu.core_type<tc>, window_params = [{transform_indices = @transform_0, window_bounds = array<i64: 4, 16, 8>}, {transform_indices = @transform_1, window_bounds = array<i64: 4, 16, 16>}, {transform_indices = @transform_2, window_bounds = array<i64: 4, 1, 8>}, {pipeline_mode = #tpu.pipeline_mode<synchronous>, transform_indices = @transform_3, window_bounds = array<i64: 24, 32>}, {pipeline_mode = #tpu.pipeline_mode<synchronous>, transform_indices = @transform_4, window_bounds = array<i64: 8, 32>}, {pipeline_mode = #tpu.pipeline_mode<synchronous>, transform_indices = @transform_5, window_bounds = array<i64: 3, 32, 32>}, {pipeline_mode = #tpu.pipeline_mode<synchronous>, transform_indices = @transform_6, window_bounds = array<i64: 4, 3, 32>}, {transform_indices = @transform_7, window_bounds = array<i64: 4, 16, 32>}]} {
    %c0 = arith.constant 0 : index
    %c0_0 = arith.constant 0 : index
    %c0_1 = arith.constant 0 : index
    %0 = vector.load %arg1[%c0, %c0_0, %c0_1] : memref<4x16x8xf32, #tpu.memory_space<vmem>>, vector<4x16x8xf32>
    %c0_2 = arith.constant 0 : index
    %c0_3 = arith.constant 0 : index
    %c0_4 = arith.constant 0 : index
    %1 = vector.load %arg2[%c0_2, %c0_3, %c0_4] : memref<4x16x16xf32, #tpu.memory_space<vmem>>, vector<4x16x16xf32>
    %2 = tpu.transpose %1, [0, 2, 1] : vector<4x16x16xf32> -> vector<4x16x16xf32>
    "tpu.trace_start"() <{level = 10 : i32, message = "bij,bjd->bid"}> : () -> ()
    %cst = arith.constant dense<0.000000e+00> : vector<4x16x8xf32>
    %3 = tpu.matmul %2, %0, %cst {dimension_numbers = #tpu.dot_dimension_numbers<[2], [1], [1], [2], [0, 0, 0, 1, 1, 2], [0], [0]>} : vector<4x16x16xf32>, vector<4x16x8xf32>, vector<4x16x8xf32> -> vector<4x16x8xf32>
    %cst_5 = arith.constant dense<0.000000e+00> : vector<4x16x8xf32>
    %4 = tpu.matmul %1, %0, %cst_5 {dimension_numbers = #tpu.dot_dimension_numbers<[2], [1], [1], [2], [0, 0, 0, 1, 1, 2], [0], [0]>} : vector<4x16x16xf32>, vector<4x16x8xf32>, vector<4x16x8xf32> -> vector<4x16x8xf32>
    "tpu.trace_stop"() : () -> ()
    %5 = vector.shape_cast %3 : vector<4x16x8xf32> to vector<64x8xf32>
    %6 = vector.shape_cast %4 : vector<4x16x8xf32> to vector<64x8xf32>
    %7 = vector.shape_cast %0 : vector<4x16x8xf32> to vector<64x8xf32>
    %8 = tpu.concatenate %5, %6, %7 in 1 : vector<64x8xf32>, vector<64x8xf32>, vector<64x8xf32> -> vector<64x24xf32>
    %c0_6 = arith.constant 0 : index
    %c0_7 = arith.constant 0 : index
    %c0_8 = arith.constant 0 : index
    %9 = vector.load %arg7[%c0_6, %c0_7, %c0_8] : memref<4x3x32xf32, #tpu.memory_space<vmem>>, vector<1x3x32xf32>
    %10 = vector.shape_cast %9 : vector<1x3x32xf32> to vector<3x32xf32>
    %c0_9 = arith.constant 0 : index
    %c0_10 = arith.constant 0 : index
    %11 = vector.load %arg4[%c0_9, %c0_10] : memref<24x32xf32, #tpu.memory_space<vmem>>, vector<24x32xf32>
    %cst_11 = arith.constant dense<0.000000e+00> : vector<64x32xf32>
    %12 = tpu.matmul %8, %11, %cst_11 {dimension_numbers = #tpu.dot_dimension_numbers<[1], [0], [0], [1], [0, 0, 1, 1], [], []>} : vector<64x24xf32>, vector<24x32xf32>, vector<64x32xf32> -> vector<64x32xf32>
    %c0_12 = arith.constant 0 : index
    %c0_13 = arith.constant 0 : index
    %c0_14 = arith.constant 0 : index
    %13 = vector.load %arg3[%c0_12, %c0_13, %c0_14] : memref<4x1x8xf32, #tpu.memory_space<vmem>>, vector<4x1x8xf32>
    %14 = vector.shape_cast %13 : vector<4x1x8xf32> to vector<4x8xf32>
    %c0_15 = arith.constant 0 : index
    %c0_16 = arith.constant 0 : index
    %15 = vector.load %arg5[%c0_15, %c0_16] : memref<8x32xf32, #tpu.memory_space<vmem>>, vector<8x32xf32>
    %cst_17 = arith.constant dense<0.000000e+00> : vector<4x32xf32>
    %16 = tpu.matmul %14, %15, %cst_17 {dimension_numbers = #tpu.dot_dimension_numbers<[1], [0], [0], [1], [0, 0, 1, 1], [], []>} : vector<4x8xf32>, vector<8x32xf32>, vector<4x32xf32> -> vector<4x32xf32>
    %17 = vector.extract_strided_slice %10 {offsets = [0, 0], sizes = [1, 32], strides = [1, 1]} : vector<3x32xf32> to vector<1x32xf32>
    %18 = vector.broadcast %17 : vector<1x32xf32> to vector<4x32xf32>
    %19 = arith.addf %16, %18 : vector<4x32xf32>
    %20 = vector.shape_cast %12 : vector<64x32xf32> to vector<4x16x32xf32>
    %21 = vector.shape_cast %19 : vector<4x32xf32> to vector<4x1x32xf32>
    %22 = vector.broadcast %21 : vector<4x1x32xf32> to vector<4x16x32xf32>
    %23 = arith.addf %20, %22 : vector<4x16x32xf32>
    %24 = vector.shape_cast %23 : vector<4x16x32xf32> to vector<64x32xf32>
    %25 = vector.extract_strided_slice %10 {offsets = [1, 0], sizes = [1, 32], strides = [1, 1]} : vector<3x32xf32> to vector<1x32xf32>
    %26 = vector.extract_strided_slice %10 {offsets = [2, 0], sizes = [1, 32], strides = [1, 1]} : vector<3x32xf32> to vector<1x32xf32>
    %cst_18 = arith.constant dense<0.000000e+00> : vector<64xf32>
    %27 = vector.multi_reduction <add>, %24, %cst_18 [1] : vector<64x32xf32> to vector<64xf32>
    %28 = vector.shape_cast %27 : vector<64xf32> to vector<64x1xf32>
    %cst_19 = arith.constant 3.200000e+01 : f32
    %29 = vector.broadcast %cst_19 : f32 to vector<64x1xf32>
    %30 = arith.divf %28, %29 : vector<64x1xf32>
    %31 = vector.broadcast %30 : vector<64x1xf32> to vector<64x32xf32>
    %32 = arith.subf %24, %31 : vector<64x32xf32>
    %33 = arith.mulf %32, %32 : vector<64x32xf32>
    %cst_20 = arith.constant dense<0.000000e+00> : vector<64xf32>
    %34 = vector.multi_reduction <add>, %33, %cst_20 [1] : vector<64x32xf32> to vector<64xf32>
    %35 = vector.shape_cast %34 : vector<64xf32> to vector<64x1xf32>
    %cst_21 = arith.constant 3.200000e+01 : f32
    %36 = vector.broadcast %cst_21 : f32 to vector<64x1xf32>
    %37 = arith.divf %35, %36 : vector<64x1xf32>
    %38 = vector.broadcast %30 : vector<64x1xf32> to vector<64x32xf32>
    %39 = arith.subf %24, %38 : vector<64x32xf32>
    %cst_22 = arith.constant 9.99999974E-6 : f32
    %40 = vector.broadcast %cst_22 : f32 to vector<64x1xf32>
    %41 = arith.addf %37, %40 : vector<64x1xf32>
    %42 = math.rsqrt %41 : vector<64x1xf32>
    %43 = vector.broadcast %42 : vector<64x1xf32> to vector<64x32xf32>
    %44 = arith.mulf %39, %43 : vector<64x32xf32>
    %45 = vector.broadcast %25 : vector<1x32xf32> to vector<64x32xf32>
    %46 = arith.mulf %44, %45 : vector<64x32xf32>
    %47 = vector.broadcast %26 : vector<1x32xf32> to vector<64x32xf32>
    %48 = arith.addf %46, %47 : vector<64x32xf32>
    %49 = math.tanh %48 : vector<64x32xf32>
    %c1 = arith.constant 1 : index
    %c0_23 = arith.constant 0 : index
    %c0_24 = arith.constant 0 : index
    %50 = vector.load %arg7[%c1, %c0_23, %c0_24] : memref<4x3x32xf32, #tpu.memory_space<vmem>>, vector<1x3x32xf32>
    %51 = vector.shape_cast %50 : vector<1x3x32xf32> to vector<3x32xf32>
    %c0_25 = arith.constant 0 : index
    %c0_26 = arith.constant 0 : index
    %c0_27 = arith.constant 0 : index
    %52 = vector.load %arg6[%c0_25, %c0_26, %c0_27] : memref<3x32x32xf32, #tpu.memory_space<vmem>>, vector<1x32x32xf32>
    %53 = vector.shape_cast %52 : vector<1x32x32xf32> to vector<32x32xf32>
    %cst_28 = arith.constant dense<0.000000e+00> : vector<64x32xf32>
    %54 = tpu.matmul %49, %53, %cst_28 {dimension_numbers = #tpu.dot_dimension_numbers<[1], [0], [0], [1], [0, 0, 1, 1], [], []>} : vector<64x32xf32>, vector<32x32xf32>, vector<64x32xf32> -> vector<64x32xf32>
    %55 = vector.extract_strided_slice %51 {offsets = [0, 0], sizes = [1, 32], strides = [1, 1]} : vector<3x32xf32> to vector<1x32xf32>
    %56 = vector.broadcast %55 : vector<1x32xf32> to vector<64x32xf32>
    %57 = arith.addf %54, %56 : vector<64x32xf32>
    %58 = vector.extract_strided_slice %51 {offsets = [1, 0], sizes = [1, 32], strides = [1, 1]} : vector<3x32xf32> to vector<1x32xf32>
    %59 = vector.extract_strided_slice %51 {offsets = [2, 0], sizes = [1, 32], strides = [1, 1]} : vector<3x32xf32> to vector<1x32xf32>
    %cst_29 = arith.constant dense<0.000000e+00> : vector<64xf32>
    %60 = vector.multi_reduction <add>, %57, %cst_29 [1] : vector<64x32xf32> to vector<64xf32>
    %61 = vector.shape_cast %60 : vector<64xf32> to vector<64x1xf32>
    %cst_30 = arith.constant 3.200000e+01 : f32
    %62 = vector.broadcast %cst_30 : f32 to vector<64x1xf32>
    %63 = arith.divf %61, %62 : vector<64x1xf32>
    %64 = vector.broadcast %63 : vector<64x1xf32> to vector<64x32xf32>
    %65 = arith.subf %57, %64 : vector<64x32xf32>
    %66 = arith.mulf %65, %65 : vector<64x32xf32>
    %cst_31 = arith.constant dense<0.000000e+00> : vector<64xf32>
    %67 = vector.multi_reduction <add>, %66, %cst_31 [1] : vector<64x32xf32> to vector<64xf32>
    %68 = vector.shape_cast %67 : vector<64xf32> to vector<64x1xf32>
    %cst_32 = arith.constant 3.200000e+01 : f32
    %69 = vector.broadcast %cst_32 : f32 to vector<64x1xf32>
    %70 = arith.divf %68, %69 : vector<64x1xf32>
    %71 = vector.broadcast %63 : vector<64x1xf32> to vector<64x32xf32>
    %72 = arith.subf %57, %71 : vector<64x32xf32>
    %cst_33 = arith.constant 9.99999974E-6 : f32
    %73 = vector.broadcast %cst_33 : f32 to vector<64x1xf32>
    %74 = arith.addf %70, %73 : vector<64x1xf32>
    %75 = math.rsqrt %74 : vector<64x1xf32>
    %76 = vector.broadcast %75 : vector<64x1xf32> to vector<64x32xf32>
    %77 = arith.mulf %72, %76 : vector<64x32xf32>
    %78 = vector.broadcast %58 : vector<1x32xf32> to vector<64x32xf32>
    %79 = arith.mulf %77, %78 : vector<64x32xf32>
    %80 = vector.broadcast %59 : vector<1x32xf32> to vector<64x32xf32>
    %81 = arith.addf %79, %80 : vector<64x32xf32>
    %82 = math.tanh %81 : vector<64x32xf32>
    %c2 = arith.constant 2 : index
    %c0_34 = arith.constant 0 : index
    %c0_35 = arith.constant 0 : index
    %83 = vector.load %arg7[%c2, %c0_34, %c0_35] : memref<4x3x32xf32, #tpu.memory_space<vmem>>, vector<1x3x32xf32>
    %84 = vector.shape_cast %83 : vector<1x3x32xf32> to vector<3x32xf32>
    %c1_36 = arith.constant 1 : index
    %c0_37 = arith.constant 0 : index
    %c0_38 = arith.constant 0 : index
    %85 = vector.load %arg6[%c1_36, %c0_37, %c0_38] : memref<3x32x32xf32, #tpu.memory_space<vmem>>, vector<1x32x32xf32>
    %86 = vector.shape_cast %85 : vector<1x32x32xf32> to vector<32x32xf32>
    %cst_39 = arith.constant dense<0.000000e+00> : vector<64x32xf32>
    %87 = tpu.matmul %82, %86, %cst_39 {dimension_numbers = #tpu.dot_dimension_numbers<[1], [0], [0], [1], [0, 0, 1, 1], [], []>} : vector<64x32xf32>, vector<32x32xf32>, vector<64x32xf32> -> vector<64x32xf32>
    %88 = vector.extract_strided_slice %84 {offsets = [0, 0], sizes = [1, 32], strides = [1, 1]} : vector<3x32xf32> to vector<1x32xf32>
    %89 = vector.broadcast %88 : vector<1x32xf32> to vector<64x32xf32>
    %90 = arith.addf %87, %89 : vector<64x32xf32>
    %91 = vector.extract_strided_slice %84 {offsets = [1, 0], sizes = [1, 32], strides = [1, 1]} : vector<3x32xf32> to vector<1x32xf32>
    %92 = vector.extract_strided_slice %84 {offsets = [2, 0], sizes = [1, 32], strides = [1, 1]} : vector<3x32xf32> to vector<1x32xf32>
    %cst_40 = arith.constant dense<0.000000e+00> : vector<64xf32>
    %93 = vector.multi_reduction <add>, %90, %cst_40 [1] : vector<64x32xf32> to vector<64xf32>
    %94 = vector.shape_cast %93 : vector<64xf32> to vector<64x1xf32>
    %cst_41 = arith.constant 3.200000e+01 : f32
    %95 = vector.broadcast %cst_41 : f32 to vector<64x1xf32>
    %96 = arith.divf %94, %95 : vector<64x1xf32>
    %97 = vector.broadcast %96 : vector<64x1xf32> to vector<64x32xf32>
    %98 = arith.subf %90, %97 : vector<64x32xf32>
    %99 = arith.mulf %98, %98 : vector<64x32xf32>
    %cst_42 = arith.constant dense<0.000000e+00> : vector<64xf32>
    %100 = vector.multi_reduction <add>, %99, %cst_42 [1] : vector<64x32xf32> to vector<64xf32>
    %101 = vector.shape_cast %100 : vector<64xf32> to vector<64x1xf32>
    %cst_43 = arith.constant 3.200000e+01 : f32
    %102 = vector.broadcast %cst_43 : f32 to vector<64x1xf32>
    %103 = arith.divf %101, %102 : vector<64x1xf32>
    %104 = vector.broadcast %96 : vector<64x1xf32> to vector<64x32xf32>
    %105 = arith.subf %90, %104 : vector<64x32xf32>
    %cst_44 = arith.constant 9.99999974E-6 : f32
    %106 = vector.broadcast %cst_44 : f32 to vector<64x1xf32>
    %107 = arith.addf %103, %106 : vector<64x1xf32>
    %108 = math.rsqrt %107 : vector<64x1xf32>
    %109 = vector.broadcast %108 : vector<64x1xf32> to vector<64x32xf32>
    %110 = arith.mulf %105, %109 : vector<64x32xf32>
    %111 = vector.broadcast %91 : vector<1x32xf32> to vector<64x32xf32>
    %112 = arith.mulf %110, %111 : vector<64x32xf32>
    %113 = vector.broadcast %92 : vector<1x32xf32> to vector<64x32xf32>
    %114 = arith.addf %112, %113 : vector<64x32xf32>
    %115 = math.tanh %114 : vector<64x32xf32>
    %c3 = arith.constant 3 : index
    %c0_45 = arith.constant 0 : index
    %c0_46 = arith.constant 0 : index
    %116 = vector.load %arg7[%c3, %c0_45, %c0_46] : memref<4x3x32xf32, #tpu.memory_space<vmem>>, vector<1x3x32xf32>
    %117 = vector.shape_cast %116 : vector<1x3x32xf32> to vector<3x32xf32>
    %c2_47 = arith.constant 2 : index
    %c0_48 = arith.constant 0 : index
    %c0_49 = arith.constant 0 : index
    %118 = vector.load %arg6[%c2_47, %c0_48, %c0_49] : memref<3x32x32xf32, #tpu.memory_space<vmem>>, vector<1x32x32xf32>
    %119 = vector.shape_cast %118 : vector<1x32x32xf32> to vector<32x32xf32>
    %cst_50 = arith.constant dense<0.000000e+00> : vector<64x32xf32>
    %120 = tpu.matmul %115, %119, %cst_50 {dimension_numbers = #tpu.dot_dimension_numbers<[1], [0], [0], [1], [0, 0, 1, 1], [], []>} : vector<64x32xf32>, vector<32x32xf32>, vector<64x32xf32> -> vector<64x32xf32>
    %121 = vector.extract_strided_slice %117 {offsets = [0, 0], sizes = [1, 32], strides = [1, 1]} : vector<3x32xf32> to vector<1x32xf32>
    %122 = vector.broadcast %121 : vector<1x32xf32> to vector<64x32xf32>
    %123 = arith.addf %120, %122 : vector<64x32xf32>
    %124 = vector.extract_strided_slice %117 {offsets = [1, 0], sizes = [1, 32], strides = [1, 1]} : vector<3x32xf32> to vector<1x32xf32>
    %125 = vector.extract_strided_slice %117 {offsets = [2, 0], sizes = [1, 32], strides = [1, 1]} : vector<3x32xf32> to vector<1x32xf32>
    %cst_51 = arith.constant dense<0.000000e+00> : vector<64xf32>
    %126 = vector.multi_reduction <add>, %123, %cst_51 [1] : vector<64x32xf32> to vector<64xf32>
    %127 = vector.shape_cast %126 : vector<64xf32> to vector<64x1xf32>
    %cst_52 = arith.constant 3.200000e+01 : f32
    %128 = vector.broadcast %cst_52 : f32 to vector<64x1xf32>
    %129 = arith.divf %127, %128 : vector<64x1xf32>
    %130 = vector.broadcast %129 : vector<64x1xf32> to vector<64x32xf32>
    %131 = arith.subf %123, %130 : vector<64x32xf32>
    %132 = arith.mulf %131, %131 : vector<64x32xf32>
    %cst_53 = arith.constant dense<0.000000e+00> : vector<64xf32>
    %133 = vector.multi_reduction <add>, %132, %cst_53 [1] : vector<64x32xf32> to vector<64xf32>
    %134 = vector.shape_cast %133 : vector<64xf32> to vector<64x1xf32>
    %cst_54 = arith.constant 3.200000e+01 : f32
    %135 = vector.broadcast %cst_54 : f32 to vector<64x1xf32>
    %136 = arith.divf %134, %135 : vector<64x1xf32>
    %137 = vector.broadcast %129 : vector<64x1xf32> to vector<64x32xf32>
    %138 = arith.subf %123, %137 : vector<64x32xf32>
    %cst_55 = arith.constant 9.99999974E-6 : f32
    %139 = vector.broadcast %cst_55 : f32 to vector<64x1xf32>
    %140 = arith.addf %136, %139 : vector<64x1xf32>
    %141 = math.rsqrt %140 : vector<64x1xf32>
    %142 = vector.broadcast %141 : vector<64x1xf32> to vector<64x32xf32>
    %143 = arith.mulf %138, %142 : vector<64x32xf32>
    %144 = vector.broadcast %124 : vector<1x32xf32> to vector<64x32xf32>
    %145 = arith.mulf %143, %144 : vector<64x32xf32>
    %146 = vector.broadcast %125 : vector<1x32xf32> to vector<64x32xf32>
    %147 = arith.addf %145, %146 : vector<64x32xf32>
    %148 = math.tanh %147 : vector<64x32xf32>
    %149 = vector.shape_cast %148 : vector<64x32xf32> to vector<4x16x32xf32>
    %c0_56 = arith.constant 0 : index
    %c0_57 = arith.constant 0 : index
    %c0_58 = arith.constant 0 : index
    %150 = vector.load %arg8[%c0_56, %c0_57, %c0_58] : memref<4x16x32xf32, #tpu.memory_space<vmem>>, vector<4x16x32xf32>
    tpu.vector_store %arg8[%c0_56, %c0_57, %c0_58], %149 {strides = array<i32>} : memref<4x16x32xf32, #tpu.memory_space<vmem>>, vector<4x16x32xf32>,
    return
  }
  func.func @transform_0(%arg0: i32) -> (i32, i32, i32) {
    %c0_i32 = arith.constant 0 : i32
    %c0_i32_0 = arith.constant 0 : i32
    %c0_i32_1 = arith.constant 0 : i32
    return %arg0, %c0_i32, %c0_i32_0 : i32, i32, i32
  }
  func.func @transform_1(%arg0: i32) -> (i32, i32, i32) {
    %c0_i32 = arith.constant 0 : i32
    %c0_i32_0 = arith.constant 0 : i32
    %c0_i32_1 = arith.constant 0 : i32
    return %arg0, %c0_i32, %c0_i32_0 : i32, i32, i32
  }
  func.func @transform_2(%arg0: i32) -> (i32, i32, i32) {
    %c0_i32 = arith.constant 0 : i32
    %c0_i32_0 = arith.constant 0 : i32
    %c0_i32_1 = arith.constant 0 : i32
    return %arg0, %c0_i32, %c0_i32_0 : i32, i32, i32
  }
  func.func @transform_3(%arg0: i32) -> (i32, i32) {
    %c0_i32 = arith.constant 0 : i32
    %c0_i32_0 = arith.constant 0 : i32
    %c0_i32_1 = arith.constant 0 : i32
    return %c0_i32, %c0_i32_0 : i32, i32
  }
  func.func @transform_4(%arg0: i32) -> (i32, i32) {
    %c0_i32 = arith.constant 0 : i32
    %c0_i32_0 = arith.constant 0 : i32
    %c0_i32_1 = arith.constant 0 : i32
    return %c0_i32, %c0_i32_0 : i32, i32
  }
  func.func @transform_5(%arg0: i32) -> (i32, i32, i32) {
    %c0_i32 = arith.constant 0 : i32
    %c0_i32_0 = arith.constant 0 : i32
    %c0_i32_1 = arith.constant 0 : i32
    %c0_i32_2 = arith.constant 0 : i32
    return %c0_i32, %c0_i32_0, %c0_i32_1 : i32, i32, i32
  }
  func.func @transform_6(%arg0: i32) -> (i32, i32, i32) {
    %c0_i32 = arith.constant 0 : i32
    %c0_i32_0 = arith.constant 0 : i32
    %c0_i32_1 = arith.constant 0 : i32
    %c0_i32_2 = arith.constant 0 : i32
    return %c0_i32, %c0_i32_0, %c0_i32_1 : i32, i32, i32
  }
  func.func @transform_7(%arg0: i32) -> (i32, i32, i32) {
    %c0_i32 = arith.constant 0 : i32
    %c0_i32_0 = arith.constant 0 : i32
    %c0_i32_1 = arith.constant 0 : i32
    return %arg0, %c0_i32, %c0_i32_0 : i32, i32, i32
  }
}

</mosaic_0001>

<bundles_post_ra>
// kernel: tpu_custom_call.1
= control target key start
LH: loop header
LB: loop body
LE: loop exit
PB: predicated region body
PF: predicated region fallthrough
CT: control target
= control target key end

     0   :  { %12 = vsyncpa [#allocation3], 0  ;;  %s4209_s0 = inlined_call_operand.vmem [shape: f32[8,16,8], index: 0, kind: input, shape index: {}]   ;;  %s4210_s1 = inlined_call_operand.vmem [shape: f32[8,16,16], index: 1, kind: input, shape index: {}]   ;;  %s4211_s2 = inlined_call_operand.hbm [shape: f32[8,1,8], index: 2, kind: input, shape index: {}]   ;;  %s4212_s3 = inlined_call_operand.hbm [shape: f32[24,32], index: 3, kind: input, shape index: {}]   ;;  %s4213_s4 = inlined_call_operand.hbm [shape: f32[8,32], index: 4, kind: input, shape index: {}]   ;;  %s4214_s5 = inlined_call_operand.vmem [shape: f32[3,32,32], index: 5, kind: input, shape index: {}]   ;;  %s4215_s6 = inlined_call_operand.vmem [shape: f32[4,3,32], index: 6, kind: input, shape index: {}]   ;;  %s4216_s7 = inlined_call_operand.hbm [shape: f32[8,16,32], index: 7, kind: output, shape index: {}]  }
   0x1   :  { %14 = vsyncpa [#allocation3 + $0x1], 0 }
   0x2   :  { %15 = vsyncpa [#allocation6], 0 }
   0x3   :  { %16 = vsyncpa [#allocation4], 0 }
   0x4   :  { %18 = vsyncpa [#allocation4 + $0x1], 0  ;;  %s3438_s24 = smov 0   ;;  %s3440_s25 = smov 0  }
   0x5   :  { %s3442_s26 = smov 0   ;;  %s3444_s27 = smov 0  }
   0x6 LB: > { %s3459_s28 = sadd.s32 4294967295, %s3382_s27   ;;  %s2650_s29 = sadd.s32 4294967294, %s3382_s27   ;;  %s3382_s27 = sphi %s3444_s27, %s4236_s27   ;;  %s3378_s26 = sphi %s3442_s26, %s4235_s26   ;;  %s3374_s25 = sphi %s3440_s25, %s4234_s25   ;;  %s3370_s24 = sphi %s3438_s24, %s4233_s24  }
   0x7   : > { %p96_p0 = scmp.ne.s32.totalorder %s3374_s25, %s3370_s24  ;;  %p4217_p1 = scmp.eq.s32.totalorder %s3459_s28, 0 }
   0x8   : > { %p210_p3 = scmp.eq.s32.totalorder %s2650_s29, 1  ;;  %p2651_p5 = scmp.ge.s32.totalorder %s3382_s27, 1 }
   0x9   : > { %p3468_p4 = por %p4217_p1, %p96_p0  ;;  %p217_p7 = scmp.lt.s32.totalorder %s3382_s27, 3 }
   0xa   : > { %p3473_p6 = por %p210_p3, %p96_p0  ;;  %s3384_s10 = smov [#allocation5]  }
   0xb   : > { %s4220_s30 = scalar_select %p3468_p4, 1, 0 }
   0xc   : > { %s4221_s8 = scalar_select %p3473_p6, 1, 0 }
   0xd   : > { %p3478_p8 = pnand %p2651_p5, %p217_p7  ;;  %s229_s11 = sshll.u32 %s3384_s10, 4  ;;  %s3482_s11 = int_to_ptr.vmem [resolvable:$true] %s229_s11 }
   0xe   : > { %s3385_s13 = smov [#allocation7]   ;;  %s3226_s17 = scalar_lea.hbm %s4212_s3, 384 }
   0xf   : > { %p3032_p9 = pneg %p3478_p8  ;;  %s243_s14 = sshll.u32 %s3385_s13, 4  ;;  %s3493_s14 = int_to_ptr.vmem [resolvable:$true] %s243_s14 }
  0x10   : > { %p3227_p12 = scmp.ne.s32.totalorder %s4212_s3, %s3226_s17  ;;  %p3233_p5 = scmp.lt.u32.totalorder %s3226_s17, %s4212_s3 }
  0x11   : > { %p3489_p11 = pnand %p3032_p9, %p4217_p1 }
  0x13   : > { %p3228_p13 = pneg %p3489_p11 }
  0x15   : > { %p3229_p0 = pnand %p3228_p13, %p3227_p12 }
  0x17   : > { %p3230_p3 = pneg %p3229_p0 }
  0x19   : > { %p3235_p7 = pnand %p3233_p5, %p3230_p3 }
  0x1b   : > { %3238 = shalt.err (!%p3235_p7)
}
  0x1c   : > { %s3239_s22 = scalar_lea.vmem %s3482_s11, 384  ;;  %p3247_p2 = scmp.lt.s32.totalorder %s3482_s11, %s3482_s11 }
  0x1d   : > { %p3240_p9 = scmp.ne.s32.totalorder %s3482_s11, %s3239_s22  ;;  %p3248_p12 = scmp.lt.s32.totalorder %s3239_s22, %s3239_s22 }
  0x1f   : > { %p3242_p10 = pnand %p3240_p9, %p3228_p13  ;;  %p3249_p0 = por %p3248_p12, %p3247_p2 }
  0x21   : > { %p3243_p1 = pneg %p3242_p10 }
  0x23   : > { %p3250_p6 = pnand %p3249_p0, %p3243_p1 }
  0x25   : > { %3253 = shalt.err (!%p3250_p6)
}
  0x26   : > { %s3386_s23 = smov 128   ;;  %s3387_s29 = smov 8  }
  0x27   : > { %3035 = dma.hbm_to_vmem [thread:$0]  (!%p3489_p11), %s4212_s3, 384, %s3482_s11, [#allocation6], %s3386_s23, %s3386_s23, %s3387_s29  }
  0x28   : > { %s3254_s17 = scalar_lea.hbm %s4213_s4, 128 }
  0x29   : > { %p3255_p2 = scmp.ne.s32.totalorder %s4213_s4, %s3254_s17  ;;  %p3261_p10 = scmp.lt.u32.totalorder %s3254_s17, %s4213_s4 }
  0x2b   : > { %p3257_p1 = pnand %p3255_p2, %p3228_p13 }
  0x2d   : > { %p3258_p6 = pneg %p3257_p1 }
  0x2f   : > { %p3263_p3 = pnand %p3261_p10, %p3258_p6 }
  0x31   : > { %3266 = shalt.err (!%p3263_p3)
}
  0x32   : > { %s3267_s11 = scalar_lea.vmem %s3493_s14, 128  ;;  %p3275_p12 = scmp.lt.s32.totalorder %s3493_s14, %s3493_s14 }
  0x33   : > { %p3268_p5 = scmp.ne.s32.totalorder %s3493_s14, %s3267_s11  ;;  %p3276_p0 = scmp.lt.s32.totalorder %s3267_s11, %s3267_s11 }
  0x35   : > { %p3270_p7 = pnand %p3268_p5, %p3228_p13  ;;  %p3277_p2 = por %p3276_p0, %p3275_p12 }
  0x37   : > { %p3271_p9 = pneg %p3270_p7 }
  0x39   : > { %p3278_p1 = pnand %p3277_p2, %p3271_p9 }
  0x3b   : > { %3281 = shalt.err (!%p3278_p1)
}
  0x3c   : > { %3038 = dma.hbm_to_vmem [thread:$0]  (!%p3489_p11), %s4213_s4, 128, %s3493_s14, [#allocation6]  }
  0x3d   : > { %s3548_s29 = sadd.s32 1, %s3382_s27   ;;  %s83_s12 = sadd.s32 1, %s3378_s26 }
  0x3e   : > { %s80_s10 = ssub.s32 %s3382_s27, %s3548_s29  ;;  %p90_p13 = scmp.ne.s32.totalorder %s3378_s26, %s3374_s25 }
  0x3f   : > { %p81_p6 = scmp.eq.s32.totalorder %s80_s10, 0  ;;  %p91_p10 = scmp.eq.s32.totalorder %s3382_s27, 0 }
  0x40   : > { %p4224_p3 = scmp.eq.s32.totalorder %s3459_s28, 1  ;;  %p3049_p7 = scmp.lt.s32.totalorder %s3382_s27, 2 }
  0x41   : > { %s3564_s15 = scalar_select %p81_p6, %s3378_s26, %s83_s12  }
  0x42   : > { %p3558_p5 = por %p4224_p3, %p90_p13  ;;  %p92_p9 = por %p91_p10, %p90_p13 }
  0x43   : > { %s280_s16 = sand.u32 1, %s3378_s26   ;;  %s2735_s14 = sshll.u32 %s3382_s27, 6 }
  0x44   : > { %s4225_s13 = scalar_select %p3558_p5, 1, 0 }
  0x45   : > { %s2655_s17 = sshll.u32 %s280_s16, 2  ;;  %s3571_s20 = scalar_lea.hbm %s4211_s2, %s2735_s14 }
  0x46   : > { %s284_s21 = scalar_lea.vmem [#allocation2], %s2655_s17  ;;  %p3575_p11 = pnand %p3049_p7, %p92_p9 }
  0x47   : > { %s291_s11 = sshll.u32 %s284_s21, 4  ;;  %s3579_s23 = scalar_lea.sflag [#allocation3], %s280_s16  ;;  %s3573_s11 = int_to_ptr.vmem [resolvable:$true] %s291_s11 }
  0x48   : > { %s3282_s12 = scalar_lea.hbm %s3571_s20, 64  ;;  %p3284_p0 = pneg %p3575_p11 }
  0x49   : > { %p3283_p12 = scmp.ne.s32.totalorder %s3571_s20, %s3282_s12  ;;  %s3287_s14 = scalar_lea.hbm %s4211_s2, 128 }
  0x4a   : > { %p3288_p13 = scmp.lt.u32.totalorder %s3571_s20, %s4211_s2  ;;  %p3289_p6 = scmp.lt.u32.totalorder %s3287_s14, %s3282_s12 }
  0x4b   : > { %p3285_p2 = pnand %p3284_p0, %p3283_p12  ;;  %p3291_p3 = scmp.lt.u32.totalorder %s3282_s12, %s3571_s20 }
  0x4c   : > { %p3290_p10 = por %p3289_p6, %p3288_p13 }
  0x4d   : > { %p3286_p1 = pneg %p3285_p2 }
  0x4e   : > { %p3292_p7 = por %p3291_p3, %p3290_p10 }
  0x50   : > { %p3293_p9 = pnand %p3292_p7, %p3286_p1 }
  0x52   : > { %3296 = shalt.err (!%p3293_p9)
}
  0x53   : > { %s3297_s16 = scalar_lea.vmem %s3573_s11, 64  ;;  %s3388_s21 = smov [#allocation2]  }
  0x54   : > { %p3298_p12 = scmp.ne.s32.totalorder %s3573_s11, %s3297_s16  ;;  %s3302_s10 = sshll.u32 %s3388_s21, 4  ;;  %s3303_s10 = int_to_ptr.vmem [resolvable:$false] %s3302_s10 }
  0x55   : > { %s3304_s17 = scalar_lea.vmem %s3303_s10, 128  ;;  %p3305_p4 = scmp.lt.s32.totalorder %s3573_s11, %s3303_s10 }
  0x56   : > { %p3300_p2 = pnand %p3298_p12, %p3284_p0  ;;  %p3306_p13 = scmp.lt.s32.totalorder %s3304_s17, %s3297_s16 }
  0x58   : > { %p3301_p5 = pneg %p3300_p2  ;;  %p3307_p6 = por %p3306_p13, %p3305_p4 }
  0x5a   : > { %p3308_p10 = pnand %p3307_p6, %p3301_p5 }
  0x5c   : > { %3311 = shalt.err (!%p3308_p10)
}
  0x5d   : > { %s3389_s12 = smov 16   ;;  %s3390_s14 = smov 1  }
  0x5e   : > { %3042 = dma.hbm_to_vmem [thread:$0]  (!%p3575_p11), %s3571_s20, 64, %s3573_s11, %s3579_s23, %s3389_s12, %s3389_s12, %s3390_s14  }
  0x5f   : > { %303 = sbr.rel (%p3478_p8) target bundleno = 2780 (0xadc), region = 48  ;;  %s3610_s18 = sand.u32 (!%p3478_p8), 1, %s3374_s25  }
  0x60   : > { %s2659_s19 = sshll.u32 (!%p3478_p8), %s3610_s18, 2  ;;  %s306_s16 = scalar_lea.sflag (!%p3478_p8), [#allocation3], %s3610_s18 }
  0x61   : > { %s3614_s21 = scalar_lea.vmem (!%p3478_p8), [#allocation2], %s2659_s19  ;;  %p4227_p4 = scmp.ne.s32.totalorder (!%p3478_p8), %s4220_s30, 0 }
  0x66   : > { %3357 = dma.done.wait (%p4227_p4), %s306_s16, 64  }
  0x67   : > { %3359 = vsyncadd (%p4227_p4), %s306_s16, 4294967232  ;;  %p4228_p5 = scmp.eq.s32.totalorder %s3459_s28, 0 }
  0x69   : > { %3361 = dma.done.wait (%p4228_p5), [#allocation6], 512   ;;  %p4229_p8 = pmov %p4228_p5 }
  0x6a   : > { %s2663_s9 = sshll.u32 %s3459_s28, 2  ;;  %s3391_s12 = smov 16   ;;  %vm520_vm0 = vcmask 130048   ;;  %v1388_v28 = vld [vmem:[#allocation7] sm:$0xff]  ;;  %v1389_v29 = vlaneseq  ;;  %v3392_v30 = vmov 0.0   ;;  %vm3393_vm1 = vmmov 0  }
  0x6b   : > { %3363 = vsyncadd (%p4229_p8), [#allocation6], 4294966784  ;;  %p361_p11 = scmp.lt.s32.totalorder %s2663_s9, 7  ;;  %v1384_v31 = vld [vmem:[%s3614_s21] sm:$0x1]  ;;  %vm1233_vm2 = vcmask 64512  }
  0x6c   : > { %v1385_v32 = vld [vmem:[%s3614_s21 + $0x1] sm:$0x1]  ;;  %v1386_v33 = vld [vmem:[%s3614_s21 + $0x2] sm:$0x1]  ;;  %v1387_v34 = vld [vmem:[%s3614_s21 + $0x3] sm:$0x1] }
  0x6d   : > { %s4238_s9 = smov (!%p361_p11, %s2663_s9), 7  ;;  %v3691_v35 = vshrl.u32 %v1389_v29, 7  ;;  %v3394_v36 = vmov 1966171168   ;;  %v1397_v38 = vcombine.low %v1384_v31, %v1385_v32  ;;  %v1398_v39 = vcombine.low %v1386_v33, %v1387_v34  ;;  %v1251_v46 = vld [vmem:[#allocation5] sm:$0xff]  ;;  %v1252_v47 = vld [vmem:[#allocation5 + $0x8] sm:$0xff] }
  0x6e   : > { %s2736_s20 = sshll.u32 %s4238_s9, 4  ;;  %v1400_v37 = vunpack.c.l.s4 %v3394_v36  ;;  %v2992_v48 = vpack.c.bf16 %v1252_v47, %v1251_v46  ;;  %v1253_v52 = vld [vmem:[#allocation5 + $0x10] sm:$0xff]  ;;  %s3395_s14 = smov 8   ;;  %vm1254_vm3 = vcmask 195584   ;;  %vm1546_vm4 = vcmask 261120  }
  0x6f   : > { %s3628_s23 = scalar_lea.vmem %s4209_s0, %s2736_s20  ;;  %s372_s30 = scalar_lea.vmem %s4210_s1, %s2736_s20 }
  0x70   : > { %v3633_v0 = vld [vmem:[%s372_s30 + $0x10] sm:$0xff]  ;;  %v3635_v1 = vld [vmem:[%s372_s30] sm:$0xff]  ;;  %v3639_v2 = vld [vmem:[%s372_s30 + $0x18] sm:$0xff]  ;;  %v1401_v40 = vunpack.c.0.s8 %v1400_v37  ;;  %s2739_s19 = sshll.u32 %s3459_s28, 10  ;;  %s2520_s28 = scalar_lea.sflag [#allocation4], %s3610_s18 }
  0x71   : > { %424 = vxpose.xlu1.b32.start [1/2] (short) (narrow) %v3633_v0, 16  ;;  %392 = vxpose.xlu0.b32.start [1/2] (short) (narrow) %v3635_v1, 16  ;;  %v3641_v3 = vld [vmem:[%s372_s30 + $0x8] sm:$0xff]  ;;  %v376_v4 = vld [vmem:[%s3628_s23] sm:$0xff]  ;;  %v378_v6 = vld [vmem:[%s3628_s23 + $0x10] sm:$0xff]  ;;  %s4160_s20 = scalar_lea.hbm %s4216_s7, %s2739_s19  ;;  %p4230_p1 = scmp.ne.s32.totalorder %s4225_s13, 0 }
  0x72   : > { %v377_v5 = vld [vmem:[%s3628_s23 + $0x8] sm:$0xff]  ;;  %v379_v7 = vld [vmem:[%s3628_s23 + $0x18] sm:$0xff]  ;;  %v390_v10 = vld [vmem:[%s372_s30 + $0x30] sm:$0xff]  ;;  %v3694_v41 = vsub.s32 %v1401_v40, %v3691_v35  ;;  %s3396_s22 = smov [#allocation8]  }
  0x73   : > { %v2960_v8 = vpack.c.bf16 %v377_v5, %v376_v4  ;;  %v2964_v9 = vpack.c.bf16 %v379_v7, %v378_v6  ;;  %v388_v11 = vld [vmem:[%s372_s30 + $0x20] sm:$0xff]  ;;  %v3650_v12 = vld [vmem:[%s3628_s23 + $0x30] sm:$0xff]  ;;  %v3653_v13 = vld [vmem:[%s3628_s23 + $0x38] sm:$0xff] }
  0x74   : > { %v2972_v14 = vpack.c.bf16 %v3653_v13, %v3650_v12  ;;  %v391_v15 = vld [vmem:[%s372_s30 + $0x38] sm:$0xff]  ;;  %v389_v16 = vld [vmem:[%s372_s30 + $0x28] sm:$0xff]  ;;  %v380_v17 = vld [vmem:[%s3628_s23 + $0x20] sm:$0xff]  ;;  %v1405_v42 = vrot.slane %v1397_v38, %v3694_v41  ;;  %v1412_v43 = vrot.slane %v1398_v39, %v3694_v41  ;;  %s2662_s30 = sshll.u32 %s3610_s18, 6 }
  0x75   : > { %425 = vxpose.xlu1.b32.end [2/2] (short) (narrow) %v3639_v2, 16  ;;  %393 = vxpose.xlu0.b32.end [2/2] (short) (narrow) %v3641_v3, 16  ;;  %v3664_v20 = vld [vmem:[%s3628_s23 + $0x28] sm:$0xff]  ;;  %s3316_s23 = sshll.u32 %s3396_s22, 4  ;;  %s3317_s23 = int_to_ptr.vmem [resolvable:$false] %s3316_s23 }
  0x76   : > { %2961 = vmatprep.subr.bf16.mxu0 %v2960_v8  ;;  %2973 = vmatprep.subr.bf16.mxu1 %v2972_v14  ;;  %v2968_v21 = vpack.c.bf16 %v3664_v20, %v380_v17  ;;  %v1413_v44 = vcombine.low %v1405_v42, %v1412_v43  ;;  %s3318_s10 = scalar_lea.vmem %s3317_s23, 2048 }
  0x77   : > { %2963 = vmatpush3.bf16.msra.mxu0 %v2960_v8  ;;  %2975 = vmatpush3.bf16.msra.mxu1 %v2972_v14 }
  0x78   : > { %2965 = vmatprep.subr.bf16.mxu0 %v2964_v9  ;;  %2981 = vmatprep.subr.bf16.mxu1 %v2964_v9  ;;  %v1420_v45 = vrot.slane %v1413_v44, %v3694_v41 }
  0x79   : > { %488 = vxpose.xlu1.b32.start [1/2] (short) (narrow) %v390_v10, 16  ;;  %456 = vxpose.xlu0.b32.start [1/2] (short) (narrow) %v388_v11, 16 }
  0x7d   : > { %489 = vxpose.xlu1.b32.end [2/2] (short) (narrow) %v391_v15, 16  ;;  %457 = vxpose.xlu0.b32.end [2/2] (short) (narrow) %v389_v16, 16 }
  0x9b   : > { %1209 = vrot.lane.b32.xlu1 %v376_v4, %s3391_s12  ;;  %v3722_v4 = vld [vmem:[%s4215_s6 + $0x4] sm:$0x7] }
  0x9f   : > { %1211 = vrot.lane.b32.xlu1 %v377_v5, %s3391_s12  ;;  %v3727_v5 = vld [vmem:[%s4215_s6 + $0x8] sm:$0x7] }
  0xa3   : > { %1213 = vrot.lane.b32.xlu1 %v378_v6, %s3391_s12 }
  0xa6   : > { %1215 = vrot.lane.b32.xlu0 %v379_v7, %s3391_s12 }
  0xa7   : > { %1217 = vrot.lane.b32.xlu1 %v380_v17, %s3391_s12 }
  0xf1   : > { %v440_v18 = vpop.trf.xlu1  ;;  %v408_v19 = vpop.trf.xlu0 }
  0xf2   : > { %2825 = vmatprep.mubr.msk.f32.mxu0 %vm520_vm0, %v408_v19 }
  0xf5   : > { %v441_v22 = vpop.trf.xlu1  ;;  %v409_v23 = vpop.trf.xlu0 }
  0xf6   : > { %2826 = vmatmul.mubr.msk.f32.vlgmr.msra.gmra.mrb[0].mxu0 %vm520_vm0, %v409_v23 }
  0xf7   : > { %2967 = vmatpush3.bf16.msra.mxu0 %v2964_v9  ;;  %2832 = vmatprep.mubr.msk.f32.mxu0 %vm520_vm0, %v440_v18 }
  0xf8   : > { %2969 = vmatprep.subr.bf16.mxu0 %v2968_v21 }
  0xf9   : > { %v504_v24 = vpop.trf.xlu1  ;;  %v472_v25 = vpop.trf.xlu0 }
  0xfa   : > { %2833 = vmatmul.mubr.msk.f32.vlgmr.msra.gmra.mrb[2].mxu0 %vm520_vm0, %v441_v22  ;;  %2846 = vmatprep.mubr.msk.f32.mxu1 %vm520_vm0, %v504_v24 }
  0xfb   : > { %2971 = vmatpush3.bf16.msra.mxu0 %v2968_v21  ;;  %2839 = vmatprep.mubr.msk.f32.mxu0 %vm520_vm0, %v472_v25 }
  0xfc   : > { %2977 = vmatprep.subr.bf16.mxu0 %v2960_v8 }
  0xfd   : > { %v505_v26 = vpop.trf.xlu1  ;;  %v473_v27 = vpop.trf.xlu0 }
  0xfe   : > { %2847 = vmatmul.mubr.msk.f32.vlgmr.msra.gmra.mrb[0].mxu1 %vm520_vm0, %v505_v26  ;;  %2840 = vmatmul.mubr.msk.f32.vlgmr.msra.gmra.mrb[4].mxu0 %vm520_vm0, %v473_v27 }
  0xff   : > { %2983 = vmatpush3.bf16.msra.mxu1 %v2964_v9  ;;  %2979 = vmatpush3.bf16.msra.mxu0 %v2960_v8  ;;  %v2716_v9 = vld [vmem:[%s4215_s6 + $0xc] sm:$0x7] }
 0x100   : > { %2860 = vmatprep.mubr.msk.f32.mxu1 %vm520_vm0, %v3633_v0  ;;  %2853 = vmatprep.mubr.msk.f32.mxu0 %vm520_vm0, %v3635_v1 }
 0x101   : > { %2985 = vmatprep.subr.bf16.mxu0 %v2968_v21  ;;  %2989 = vmatprep.subr.bf16.mxu1 %v2972_v14 }
 0x102   : > { %2861 = vmatmul.mubr.msk.f32.vlgmr.msra.gmra.mrb[2].mxu1 %vm520_vm0, %v3639_v2  ;;  %2854 = vmatmul.mubr.msk.f32.vlgmr.msra.gmra.mrb[6].mxu0 %vm520_vm0, %v3641_v3  ;;  %v3714_v2 = vsub.s32 1, %v3691_v35  ;;  %v3717_v3 = vsub.s32 2, %v3691_v35 }
 0x103   : > { %2987 = vmatpush3.bf16.msra.mxu0 %v2968_v21  ;;  %2867 = vmatprep.mubr.msk.f32.mxu0 %vm520_vm0, %v388_v11 }
 0x104   : > { %2991 = vmatpush3.bf16.msra.mxu1 %v2972_v14  ;;  %2874 = vmatprep.mubr.msk.f32.mxu1 %vm520_vm0, %v390_v10  ;;  %v3731_v6 = vrot.slane %v3722_v4, %v3714_v2  ;;  %v3735_v7 = vrot.slane %v3722_v4, %v3717_v3  ;;  %v3739_v8 = vrot.slane %v3727_v5, %v3714_v2 }
 0x105   : > { %2895 = vmatprep.subr.mxu1 %v3392_v30  ;;  %2993 = vmatprep.subr.bf16.mxu0 %v2992_v48  ;;  %v3747_v10 = vrot.slane %v3727_v5, %v3717_v3  ;;  %v3750_v11 = vrot.slane %v2716_v9, %v3714_v2  ;;  %v3753_v14 = vrot.slane %v2716_v9, %v3717_v3 }
 0x106   : > { %2868 = vmatmul.mubr.msk.f32.vlgmr.msra.gmra.mrb[8].mxu0 %vm520_vm0, %v389_v16 }
 0x107   : > { %2875 = vmatmul.mubr.msk.f32.vlgmr.msra.gmra.mrb[4].mxu1 %vm520_vm0, %v391_v15  ;;  %2995 = vmatpush3.bf16.msra.mxu0 %v2992_v48 }
 0x108   : > { %2897 = vmatprep.mubr.msk.f32.mxu1 %vm3393_vm1, %v3392_v30  ;;  %2896 = vmatpush3.msra.mxu1 %v1388_v28 }
 0x109   : > { %2881 = vmatprep.subr.mxu0 %v1253_v52 }
 0x10b   : > { %2898 = vmatmul.mubr.msk.f32.vlgmr.msra.gmra.mrb[6].mxu1 %vm1233_vm2, %v1420_v45  ;;  %2882 = vmatpush3.msra.mxu0 %v1253_v52 }
 0x10d   : > { %v1210_v15 = vpop.permute.xlu1 %1209 }
 0x111   : > { %v1212_v16 = vpop.permute.xlu1 %1211 }
 0x115   : > { %v1214_v17 = vpop.permute.xlu1 %1213 }
 0x118   : > { %v1216_v18 = vpop.permute.xlu0 %1215 }
 0x119   : > { %v1218_v19 = vpop.permute.xlu1 %1217 }
 0x1c9   : > { %v2827_v49 = vpop.f32.mrb[0].mxu0 }
 0x1ca   : > { %v593_v50 = vpop.f32.mrb[1].mxu0 }
 0x1cd   : > { %v2834_v51 = vpop.f32.mrb[2].mxu0 }
 0x1ce   : > { %v674_v53 = vpop.f32.mrb[3].mxu0 }
 0x1d1   : > { %v3700_v54 = vpop.f32.mrb[0].mxu1  ;;  %v3702_v55 = vpop.f32.mrb[4].mxu0 }
 0x1d2   : > { %v3704_v56 = vpop.f32.mrb[1].mxu1  ;;  %v755_v57 = vpop.f32.mrb[5].mxu0 }
 0x1d5   : > { %v2862_v58 = vpop.f32.mrb[2].mxu1  ;;  %v2855_v59 = vpop.f32.mrb[6].mxu0 }
 0x1d6   : > { %1183 = vrot.lane.b32.xlu0 %v2862_v58, %s3395_s14  ;;  %v998_v60 = vpop.f32.mrb[3].mxu1  ;;  %v917_v61 = vpop.f32.mrb[7].mxu0 }
 0x1d7   : > { %1181 = vrot.lane.b32.xlu1 %v998_v60, %s3395_s14 }
 0x1d9   : > { %v2869_v62 = vpop.f32.mrb[8].mxu0 }
 0x1da   : > { %1177 = vrot.lane.b32.xlu0 %v917_v61, %s3395_s14  ;;  %v1079_v63 = vpop.f32.mrb[9].mxu0  ;;  %v2876_v0 = vpop.f32.mrb[4].mxu1 }
 0x1db   : > { %1179 = vrot.lane.b32.xlu1 %v2855_v59, %s3395_s14  ;;  %v1160_v1 = vpop.f32.mrb[5].mxu1 }
 0x1de   : > { %1219 = vrot.lane.b32.xlu0 %v3664_v20, %s3391_s12  ;;  %v1489_v23 = vpop.f32.mrb[6].mxu1 }
 0x1df   : > { %1185 = vrot.lane.b32.xlu1 %v1079_v63, %s3395_s14  ;;  %v2899_v27 = vpop.f32.mrb[7].mxu1 }
 0x1e2   : > { %1187 = vrot.lane.b32.xlu0 %v2869_v62, %s3395_s14 }
 0x1e3   : > { %1189 = vrot.lane.b32.xlu1 %v1160_v1, %s3395_s14 }
 0x1e6   : > { %1191 = vrot.lane.b32.xlu0 %v2876_v0, %s3395_s14 }
 0x1e7   : > { %1221 = vrot.lane.b32.xlu1 %v3650_v12, %s3391_s12 }
 0x1ea   : > { %1223 = vrot.lane.b32.xlu0 %v3653_v13, %s3391_s12  ;;  %s359_s12 = scalar_lea.vmem [#allocation8], %s2662_s30 }
 0x1eb   : > { %s2534_s16 = sshll.u32 %s359_s12, 4  ;;  %s4162_s16 = int_to_ptr.vmem [resolvable:$true] %s2534_s16 }
 0x1ec   : > { %s3312_s11 = scalar_lea.vmem %s4162_s16, 1024  ;;  %p3319_p9 = scmp.lt.s32.totalorder %s4162_s16, %s3317_s23 }
 0x1ed   : > { %p3313_p0 = scmp.ne.s32.totalorder %s4162_s16, %s3312_s11  ;;  %p3320_p12 = scmp.lt.s32.totalorder %s3318_s10, %s3312_s11 }
 0x1ef   : > { %p3314_p3 = pnand %p3313_p0, %p4230_p1  ;;  %p3321_p2 = por %p3320_p12, %p3319_p9 }
 0x1f1   : > { %p3315_p7 = pneg %p3314_p3 }
 0x1f3   : > { %p3322_p13 = pnand %p3321_p2, %p3315_p7 }
 0x248   : > { %v1184_v20 = vpop.permute.xlu0 %1183 }
 0x249   : > { %v1182_v21 = vpop.permute.xlu1 %1181  ;;  %v1237_v29 = vsel %vm1233_vm2, %v2834_v51, %v1184_v20 }
 0x24a   : > { %v1236_v24 = vsel %vm1233_vm2, %v674_v53, %v1182_v21  ;;  %v1245_v34 = vsel %vm520_vm0, %v1237_v29, %v1216_v18 }
 0x24b   : > { %v1244_v31 = vsel %vm520_vm0, %v1236_v24, %v1214_v17 }
 0x24c   : > { %v1178_v22 = vpop.permute.xlu0 %1177 }
 0x24d   : > { %v1234_v25 = vsel %vm1233_vm2, %v593_v50, %v1178_v22  ;;  %v1180_v26 = vpop.permute.xlu1 %1179  ;;  %v3794_v50 = vld [vmem:[%s4215_s6] sm:$0x7] }
 0x24e   : > { %v1235_v12 = vsel %vm1233_vm2, %v2827_v49, %v1180_v26  ;;  %v1242_v13 = vsel %vm520_vm0, %v1234_v25, %v1210_v15  ;;  %v3789_v49 = vsub.s32 0, %v3691_v35 }
 0x24f   : > { %v1243_v28 = vsel %vm520_vm0, %v1235_v12, %v1212_v16  ;;  %2883 = vmatprep.mubr.msk.f32.mxu0 %vm1254_vm3, %v1242_v13 }
 0x250   : > { %2884 = vmatmul.mubr.msk.f32.vlgmr.msra.gmra.mrb[10].mxu0 %vm1254_vm3, %v1243_v28  ;;  %v1220_v30 = vpop.permute.xlu0 %1219  ;;  %v1392_v51 = vrot.slane %v3794_v50, %v3789_v49 }
 0x251   : > { %2886 = vmatprep.mubr.msk.f32.mxu0 %vm1254_vm3, %v1244_v31  ;;  %v1186_v32 = vpop.permute.xlu1 %1185 }
 0x252   : > { %v1238_v33 = vsel %vm1233_vm2, %v755_v57, %v1186_v32  ;;  %v1490_v52 = vadd.f32 %v1489_v23, %v1392_v51 }
 0x253   : > { %v1246_v36 = vsel %vm520_vm0, %v1238_v33, %v1218_v19 }
 0x254   : > { %2887 = vmatmul.mubr.msk.f32.gmra.mrb[12].mxu0 %vm1254_vm3, %v1245_v34  ;;  %v1188_v37 = vpop.permute.xlu0 %1187  ;;  %v1500_v53 = vrot.slane %v1490_v52, %v3694_v41 }
 0x255   : > { %v1239_v38 = vsel %vm1233_vm2, %v3702_v55, %v1188_v37  ;;  %2889 = vmatprep.mubr.msk.f32.mxu0 %vm1254_vm3, %v1246_v36  ;;  %v1190_v39 = vpop.permute.xlu1 %1189 }
 0x256   : > { %v1247_v40 = vsel %vm520_vm0, %v1239_v38, %v1220_v30  ;;  %v1240_v43 = vsel %vm1233_vm2, %v3704_v56, %v1190_v39  ;;  %v1508_v55 = vrot.slane %v1500_v53, %v3694_v41 }
 0x258   : > { %v1192_v42 = vpop.permute.xlu0 %1191  ;;  %2890 = vmatmul.mubr.msk.f32.gmra.mrb[14].mxu0 %vm1254_vm3, %v1247_v40  ;;  %v1521_v56 = vrot.slane %v1508_v55, %v3789_v49  ;;  %v1516_v63 = vcombine.high %v1508_v55, %v1508_v55 }
 0x259   : > { %v1222_v44 = vpop.permute.xlu1 %1221  ;;  %v1241_v46 = vsel %vm1233_vm2, %v3700_v54, %v1192_v42  ;;  %v1501_v54 = vcombine.high %v1500_v53, %v1500_v53 }
 0x25a   : > { %v1248_v45 = vsel %vm520_vm0, %v1240_v43, %v1222_v44 }
 0x25b   : > { %2892 = vmatprep.mubr.msk.f32.mxu0 %vm1254_vm3, %v1248_v45  ;;  %v1515_v57 = vrot.slane %v1501_v54, %v3694_v41  ;;  %v1529_v41 = vrot.slane %v1516_v63, %v3789_v49 }
 0x25c   : > { %v1224_v47 = vpop.permute.xlu0 %1223 }
 0x25d   : > { %v1249_v48 = vsel %vm520_vm0, %v1241_v46, %v1224_v47  ;;  %v1525_v60 = vrot.slane %v1515_v57, %v3789_v49  ;;  %v1517_v22 = vcombine.high %v1515_v57, %v1515_v57 }
 0x25e   : > { %2893 = vmatmul.mubr.msk.f32.gmra.mrb[16].mxu0 %vm1254_vm3, %v1249_v48 }
 0x25f   : > { %v1533_v26 = vrot.slane %v1517_v22, %v3789_v49  ;;  %v1687_v22 = vld [vmem:[%s4214_s5 + $0x8] sm:$0xff] }
 0x323   : > { %v2885_v35 = vpop.f32.mrb[10].mxu0 }
 0x324   : > { %v1539_v58 = vadd.f32 %v2885_v35, %v1521_v56  ;;  %v1345_v59 = vpop.f32.mrb[11].mxu0 }
 0x325   : > { %v1538_v61 = vadd.f32 %v1521_v56, %v1345_v59 }
 0x326   : > { %v1550_v62 = vsel %vm1546_vm4, %v1539_v58, 0.0 }
 0x327   : > { %1551 = vadd.xlane.f32.xlu0 %v1550_v62  ;;  %v2888_v0 = vpop.f32.mrb[12].mxu0  ;;  %v1547_v1 = vsel %vm1546_vm4, %v1538_v61, 0.0 }
 0x328   : > { %v1541_v9 = vadd.f32 %v2888_v0, %v1525_v60  ;;  %1548 = vadd.xlane.f32.xlu1 %v1547_v1  ;;  %v1355_v15 = vpop.f32.mrb[13].mxu0 }
 0x329   : > { %v1540_v16 = vadd.f32 %v1525_v60, %v1355_v15 }
 0x32a   : > { %v1556_v17 = vsel %vm1546_vm4, %v1541_v9, 0.0 }
 0x32b   : > { %v2891_v18 = vpop.f32.mrb[14].mxu0  ;;  %v1553_v19 = vsel %vm1546_vm4, %v1540_v16, 0.0 }
 0x32c   : > { %v1543_v20 = vadd.f32 %v2891_v18, %v1529_v41  ;;  %1557 = vadd.xlane.f32.xlu1 %v1556_v17  ;;  %1554 = vadd.xlane.f32.xlu0 %v1553_v19  ;;  %v1365_v21 = vpop.f32.mrb[15].mxu0 }
 0x32d   : > { %v1542_v23 = vadd.f32 %v1529_v41, %v1365_v21  ;;  %v1686_v21 = vld [vmem:[%s4214_s5] sm:$0xff] }
 0x32e   : > { %v1562_v24 = vsel %vm1546_vm4, %v1543_v20, 0.0 }
 0x32f   : > { %v1559_v25 = vsel %vm1546_vm4, %v1542_v23, 0.0 }
 0x330   : > { %1563 = vadd.xlane.f32.xlu1 %v1562_v24  ;;  %1560 = vadd.xlane.f32.xlu0 %v1559_v25  ;;  %v1688_v24 = vld [vmem:[%s4214_s5 + $0x10] sm:$0xff]  ;;  %v1689_v25 = vld [vmem:[%s4214_s5 + $0x18] sm:$0xff] }
 0x331   : > { %v2894_v27 = vpop.f32.mrb[16].mxu0 }
 0x332   : > { %v1545_v12 = vadd.f32 %v2894_v27, %v1533_v26  ;;  %v1375_v13 = vpop.f32.mrb[17].mxu0 }
 0x333   : > { %v1544_v28 = vadd.f32 %v1533_v26, %v1375_v13  ;;  %v3000_v26 = vpack.c.bf16 %v1689_v25, %v1688_v24 }
 0x334   : > { %v1568_v29 = vsel %vm1546_vm4, %v1545_v12, 0.0 }
 0x335   : > { %1569 = vadd.xlane.f32.xlu1 %v1568_v29  ;;  %v1565_v30 = vsel %vm1546_vm4, %v1544_v28, 0.0 }
 0x336   : > { %1566 = vadd.xlane.f32.xlu0 %v1565_v30 }
 0x3b4   : > { %v1552_v31 = vpop.xlane.xlu0 %1551 }
 0x3b5   : > { %v1573_v32 = vmul.f32 0.03125, %v1552_v31  ;;  %v1549_v33 = vpop.xlane.xlu1 %1548 }
 0x3b6   : > { %v1572_v34 = vmul.f32 0.03125, %v1549_v33 }
 0x3b7   : > { %v3813_v36 = vsub.f32 %v1539_v58, %v1573_v32 }
 0x3b8   : > { %v3815_v37 = vsub.f32 %v1538_v61, %v1572_v34 }
 0x3b9   : > { %v1558_v38 = vpop.xlane.xlu1 %1557  ;;  %v1555_v39 = vpop.xlane.xlu0 %1554  ;;  %v1589_v40 = vmul.f32 %v3813_v36, %v3813_v36 }
 0x3ba   : > { %v1575_v42 = vmul.f32 0.03125, %v1558_v38  ;;  %v1574_v43 = vmul.f32 0.03125, %v1555_v39  ;;  %v1588_v44 = vmul.f32 %v3815_v37, %v3815_v37 }
 0x3bb   : > { %v1599_v45 = vsel %vm1546_vm4, %v1589_v40, 0.0 }
 0x3bc   : > { %v3822_v46 = vsub.f32 %v1541_v9, %v1575_v42  ;;  %v3824_v47 = vsub.f32 %v1540_v16, %v1574_v43  ;;  %1600 = vadd.xlane.f32.xlu1 %v1599_v45  ;;  %v1596_v48 = vsel %vm1546_vm4, %v1588_v44, 0.0 }
 0x3bd   : > { %v1564_v51 = vpop.xlane.xlu1 %1563  ;;  %v1561_v52 = vpop.xlane.xlu0 %1560  ;;  %1597 = vadd.xlane.f32.xlu0 %v1596_v48 }
 0x3be   : > { %v1577_v53 = vmul.f32 0.03125, %v1564_v51  ;;  %v1576_v54 = vmul.f32 0.03125, %v1561_v52  ;;  %v1591_v55 = vmul.f32 %v3822_v46, %v3822_v46  ;;  %v1590_v56 = vmul.f32 %v3824_v47, %v3824_v47 }
 0x3bf   : > { %v1655_v51 = vrot.slane %v3794_v50, %v3714_v2 }
 0x3c0   : > { %v3831_v57 = vsub.f32 %v1543_v20, %v1577_v53  ;;  %v3833_v35 = vsub.f32 %v1542_v23, %v1576_v54  ;;  %v1605_v58 = vsel %vm1546_vm4, %v1591_v55, 0.0  ;;  %v1602_v59 = vsel %vm1546_vm4, %v1590_v56, 0.0 }
 0x3c1   : > { %1606 = vadd.xlane.f32.xlu1 %v1605_v58  ;;  %1603 = vadd.xlane.f32.xlu0 %v1602_v59  ;;  %v2996_v23 = vpack.c.bf16 %v1687_v22, %v1686_v21  ;;  %v1667_v58 = vrot.slane %v3794_v50, %v3717_v3 }
 0x3c2   : > { %v1570_v60 = vpop.xlane.xlu1 %1569  ;;  %v1593_v61 = vmul.f32 %v3831_v57, %v3831_v57  ;;  %v1592_v62 = vmul.f32 %v3833_v35, %v3833_v35 }
 0x3c3   : > { %v1579_v63 = vmul.f32 0.03125, %v1570_v60  ;;  %v1567_v0 = vpop.xlane.xlu0 %1566  ;;  %2997 = vmatprep.subr.bf16.mxu1 %v2996_v23 }
 0x3c4   : > { %v1578_v1 = vmul.f32 0.03125, %v1567_v0  ;;  %v1611_v9 = vsel %vm1546_vm4, %v1593_v61, 0.0  ;;  %v1608_v15 = vsel %vm1546_vm4, %v1592_v62, 0.0  ;;  %2999 = vmatpush3.bf16.msra.mxu1 %v2996_v23 }
 0x3c5   : > { %v3843_v16 = vsub.f32 %v1545_v12, %v1579_v63  ;;  %1612 = vadd.xlane.f32.xlu1 %v1611_v9  ;;  %1609 = vadd.xlane.f32.xlu0 %v1608_v15 }
 0x3c6   : > { %v3845_v41 = vsub.f32 %v1544_v28, %v1578_v1  ;;  %3001 = vmatprep.subr.bf16.mxu1 %v3000_v26 }
 0x3c7   : > { %v1595_v17 = vmul.f32 %v3843_v16, %v3843_v16 }
 0x3c8   : > { %v1594_v18 = vmul.f32 %v3845_v41, %v3845_v41  ;;  %3003 = vmatpush3.bf16.msra.mxu1 %v3000_v26 }
 0x3c9   : > { %v1617_v19 = vsel %vm1546_vm4, %v1595_v17, 0.0 }
 0x3ca   : > { %1618 = vadd.xlane.f32.xlu1 %v1617_v19  ;;  %v1614_v20 = vsel %vm1546_vm4, %v1594_v18, 0.0 }
 0x3cb   : > { %1615 = vadd.xlane.f32.xlu0 %v1614_v20 }
 0x449   : > { %v1601_v27 = vpop.xlane.xlu1 %1600 }
 0x44a   : > { %v1621_v12 = vmul.f32 0.03125, %v1601_v27  ;;  %v1598_v13 = vpop.xlane.xlu0 %1597 }
 0x44b   : > { %v1620_v28 = vmul.f32 0.03125, %v1598_v13 }
 0x44c   : > { %v1629_v29 = vadd.f32 1e-05, %v1621_v12 }
 0x44d   : > { %v1628_v30 = vadd.f32 1e-05, %v1620_v28 }
 0x44e   : > { %3097 = vrsqrt.f32 %v1629_v29  ;;  %v1607_v31 = vpop.xlane.xlu1 %1606  ;;  %v1604_v32 = vpop.xlane.xlu0 %1603 }
 0x44f   : > { %3099 = vrsqrt.f32 %v1628_v30  ;;  %v1623_v33 = vmul.f32 0.03125, %v1607_v31  ;;  %v1622_v34 = vmul.f32 0.03125, %v1604_v32 }
 0x451   : > { %v1631_v38 = vadd.f32 1e-05, %v1623_v33  ;;  %v1630_v39 = vadd.f32 1e-05, %v1622_v34 }
 0x452   : > { %v1613_v40 = vpop.xlane.xlu1 %1612  ;;  %v1610_v42 = vpop.xlane.xlu0 %1609 }
 0x453   : > { %3101 = vrsqrt.f32 %v1631_v38  ;;  %v1625_v43 = vmul.f32 0.03125, %v1613_v40  ;;  %v1624_v44 = vmul.f32 0.03125, %v1610_v42 }
 0x454   : > { %3103 = vrsqrt.f32 %v1630_v39  ;;  %v1693_v39 = vrot.slane %v3722_v4, %v3789_v49 }
 0x455   : > { %v1633_v45 = vadd.f32 1e-05, %v1625_v43  ;;  %v1632_v48 = vadd.f32 1e-05, %v1624_v44 }
 0x457   : > { %3105 = vrsqrt.f32 %v1633_v45  ;;  %v1619_v52 = vpop.xlane.xlu1 %1618 }
 0x458   : > { %v3098_v53 = vpop.eup %3097  ;;  %3107 = vrsqrt.f32 %v1632_v48  ;;  %v1627_v54 = vmul.f32 0.03125, %v1619_v52  ;;  %v1616_v55 = vpop.xlane.xlu0 %1615 }
 0x459   : > { %v3100_v56 = vpop.eup %3099  ;;  %v1645_v59 = vmul.f32 %v3098_v53, %v3813_v36  ;;  %v1626_v60 = vmul.f32 0.03125, %v1616_v55 }
 0x45a   : > { %v1644_v61 = vmul.f32 %v3100_v56, %v3815_v37  ;;  %v1635_v62 = vadd.f32 1e-05, %v1627_v54 }
 0x45b   : > { %v1657_v63 = vmul.f32 %v1655_v51, %v1645_v59  ;;  %v1634_v0 = vadd.f32 1e-05, %v1626_v60 }
 0x45c   : > { %v1656_v1 = vmul.f32 %v1655_v51, %v1644_v61  ;;  %3109 = vrsqrt.f32 %v1635_v62 }
 0x45d   : > { %v3102_v2 = vpop.eup %3101  ;;  %v1669_v9 = vadd.f32 %v1667_v58, %v1657_v63  ;;  %3111 = vrsqrt.f32 %v1634_v0 }
 0x45e   : > { %v3104_v15 = vpop.eup %3103  ;;  %v1668_v17 = vadd.f32 %v1667_v58, %v1656_v1  ;;  %v1647_v18 = vmul.f32 %v3102_v2, %v3822_v46 }
 0x45f   : > { %v1646_v19 = vmul.f32 %v3104_v15, %v3824_v47 }
 0x460   : > { %3113 = vtanh.f32 %v1668_v17  ;;  %v1659_v3 = vmul.f32 %v1655_v51, %v1647_v18 }
 0x461   : > { %v3106_v50 = vpop.eup %3105  ;;  %3115 = vtanh.f32 %v1669_v9  ;;  %v1658_v36 = vmul.f32 %v1655_v51, %v1646_v19 }
 0x462   : > { %v3108_v37 = vpop.eup %3107  ;;  %v1671_v20 = vadd.f32 %v1667_v58, %v1659_v3  ;;  %v1649_v21 = vmul.f32 %v3106_v50, %v3831_v57 }
 0x463   : > { %v1670_v22 = vadd.f32 %v1667_v58, %v1658_v36  ;;  %v1648_v23 = vmul.f32 %v3108_v37, %v3833_v35 }
 0x464   : > { %3117 = vtanh.f32 %v1671_v20  ;;  %v1661_v24 = vmul.f32 %v1655_v51, %v1649_v21 }
 0x465   : > { %3119 = vtanh.f32 %v1670_v22  ;;  %v1660_v25 = vmul.f32 %v1655_v51, %v1648_v23 }
 0x466   : > { %v3110_v26 = vpop.eup %3109  ;;  %v1673_v46 = vadd.f32 %v1667_v58, %v1661_v24 }
 0x467   : > { %v3112_v27 = vpop.eup %3111  ;;  %v1672_v47 = vadd.f32 %v1667_v58, %v1660_v25  ;;  %v1651_v12 = vmul.f32 %v3110_v26, %v3843_v16 }
 0x468   : > { %3121 = vtanh.f32 %v1673_v46  ;;  %v1650_v13 = vmul.f32 %v3112_v27, %v3845_v41 }
 0x469   : > { %3123 = vtanh.f32 %v1672_v47  ;;  %v1663_v28 = vmul.f32 %v1655_v51, %v1651_v12 }
 0x46a   : > { %v3114_v29 = vpop.eup %3113  ;;  %v1662_v57 = vmul.f32 %v1655_v51, %v1650_v13 }
 0x46b   : > { %v3116_v30 = vpop.eup %3115  ;;  %v1675_v31 = vadd.f32 %v1667_v58, %v1663_v28  ;;  %2908 = vmatprep.mubr.msk.f32.mxu1 %vm1546_vm4, %v3114_v29 }
 0x46c   : > { %v1674_v35 = vadd.f32 %v1667_v58, %v1662_v57  ;;  %2909 = vmatmul.mubr.msk.f32.vlgmr.msra.gmra.mrb[8].mxu1 %vm1546_vm4, %v3116_v30 }
 0x46e   : > { %v3118_v32 = vpop.eup %3117  ;;  %3125 = vtanh.f32 %v1674_v35 }
 0x46f   : > { %v3120_v33 = vpop.eup %3119  ;;  %3127 = vtanh.f32 %v1675_v31 }
 0x470   : > { %2911 = vmatprep.mubr.msk.f32.mxu1 %vm1546_vm4, %v3120_v33 }
 0x471   : > { %2912 = vmatmul.mubr.msk.f32.gmra.mrb[10].mxu1 %vm1546_vm4, %v3118_v32 }
 0x472   : > { %v3122_v16 = vpop.eup %3121 }
 0x473   : > { %v3124_v41 = vpop.eup %3123 }
 0x474   : > { %2914 = vmatprep.mubr.msk.f32.mxu1 %vm1546_vm4, %v3124_v41 }
 0x475   : > { %2915 = vmatmul.mubr.msk.f32.gmra.mrb[12].mxu1 %vm1546_vm4, %v3122_v16 }
 0x478   : > { %v3126_v34 = vpop.eup %3125 }
 0x479   : > { %v3128_v38 = vpop.eup %3127  ;;  %2917 = vmatprep.mubr.msk.f32.mxu1 %vm1546_vm4, %v3126_v34 }
 0x47a   : > { %2918 = vmatmul.mubr.msk.f32.gmra.mrb[14].mxu1 %vm1546_vm4, %v3128_v38 }
 0x53f   : > { %v2910_v40 = vpop.f32.mrb[8].mxu1 }
 0x540   : > { %v1790_v42 = vadd.f32 %v2910_v40, %v1693_v39  ;;  %v1784_v43 = vpop.f32.mrb[9].mxu1 }
 0x541   : > { %v1785_v44 = vadd.f32 %v1784_v43, %v1693_v39 }
 0x542   : > { %v1826_v45 = vsel %vm1546_vm4, %v1790_v42, 0.0 }
 0x543   : > { %1827 = vadd.xlane.f32.xlu1 %v1826_v45  ;;  %v1823_v48 = vsel %vm1546_vm4, %v1785_v44, 0.0 }
 0x544   : > { %v2913_v51 = vpop.f32.mrb[10].mxu1  ;;  %1824 = vadd.xlane.f32.xlu0 %v1823_v48 }
 0x545   : > { %v1800_v52 = vadd.f32 %v2913_v51, %v1693_v39  ;;  %v1794_v53 = vpop.f32.mrb[11].mxu1 }
 0x546   : > { %v1795_v54 = vadd.f32 %v1794_v53, %v1693_v39  ;;  %v2704_v53 = vld [vmem:[%s4214_s5 + $0x20] sm:$0xff] }
 0x547   : > { %v1832_v55 = vsel %vm1546_vm4, %v1800_v52, 0.0 }
 0x548   : > { %1833 = vadd.xlane.f32.xlu1 %v1832_v55  ;;  %v2916_v56 = vpop.f32.mrb[12].mxu1  ;;  %v1829_v4 = vsel %vm1546_vm4, %v1795_v54, 0.0 }
 0x549   : > { %v1810_v58 = vadd.f32 %v2916_v56, %v1693_v39  ;;  %1830 = vadd.xlane.f32.xlu0 %v1829_v4  ;;  %v1804_v59 = vpop.f32.mrb[13].mxu1  ;;  %v2706_v56 = vld [vmem:[%s4214_s5 + $0x30] sm:$0xff]  ;;  %v2707_v4 = vld [vmem:[%s4214_s5 + $0x38] sm:$0xff] }
 0x54a   : > { %v1805_v60 = vadd.f32 %v1804_v59, %v1693_v39 }
 0x54b   : > { %v1838_v61 = vsel %vm1546_vm4, %v1810_v58, 0.0 }
 0x54c   : > { %1839 = vadd.xlane.f32.xlu1 %v1838_v61  ;;  %v1835_v62 = vsel %vm1546_vm4, %v1805_v60, 0.0 }
 0x54d   : > { %1836 = vadd.xlane.f32.xlu0 %v1835_v62  ;;  %v2919_v63 = vpop.f32.mrb[14].mxu1 }
 0x54e   : > { %v1820_v0 = vadd.f32 %v2919_v63, %v1693_v39  ;;  %v1814_v1 = vpop.f32.mrb[15].mxu1 }
 0x54f   : > { %v1815_v2 = vadd.f32 %v1814_v1, %v1693_v39 }
 0x550   : > { %v1844_v9 = vsel %vm1546_vm4, %v1820_v0, 0.0 }
 0x551   : > { %1845 = vadd.xlane.f32.xlu1 %v1844_v9  ;;  %v1841_v15 = vsel %vm1546_vm4, %v1815_v2, 0.0 }
 0x552   : > { %1842 = vadd.xlane.f32.xlu0 %v1841_v15 }
 0x5d0   : > { %v1828_v17 = vpop.xlane.xlu1 %1827 }
 0x5d1   : > { %v1848_v18 = vmul.f32 0.03125, %v1828_v17  ;;  %v1825_v19 = vpop.xlane.xlu0 %1824 }
 0x5d2   : > { %v1847_v3 = vmul.f32 0.03125, %v1825_v19 }
 0x5d3   : > { %v3895_v50 = vsub.f32 %v1790_v42, %v1848_v18 }
 0x5d4   : > { %v3897_v36 = vsub.f32 %v1785_v44, %v1847_v3 }
 0x5d5   : > { %v1834_v37 = vpop.xlane.xlu1 %1833  ;;  %v1864_v20 = vmul.f32 %v3895_v50, %v3895_v50 }
 0x5d6   : > { %v1850_v21 = vmul.f32 0.03125, %v1834_v37  ;;  %v1831_v22 = vpop.xlane.xlu0 %1830  ;;  %v1863_v23 = vmul.f32 %v3897_v36, %v3897_v36 }
 0x5d7   : > { %v1849_v24 = vmul.f32 0.03125, %v1831_v22  ;;  %v1874_v25 = vsel %vm1546_vm4, %v1864_v20, 0.0 }
 0x5d8   : > { %v3904_v26 = vsub.f32 %v1800_v52, %v1850_v21  ;;  %1875 = vadd.xlane.f32.xlu1 %v1874_v25  ;;  %v1871_v46 = vsel %vm1546_vm4, %v1863_v23, 0.0 }
 0x5d9   : > { %v3907_v27 = vsub.f32 %v1795_v54, %v1849_v24  ;;  %v1840_v47 = vpop.xlane.xlu1 %1839  ;;  %1872 = vadd.xlane.f32.xlu0 %v1871_v46  ;;  %v2705_v54 = vld [vmem:[%s4214_s5 + $0x28] sm:$0xff] }
 0x5da   : > { %v1852_v12 = vmul.f32 0.03125, %v1840_v47  ;;  %v1837_v13 = vpop.xlane.xlu0 %1836  ;;  %v1866_v28 = vmul.f32 %v3904_v26, %v3904_v26  ;;  %v3004_v55 = vpack.c.bf16 %v2705_v54, %v2704_v53 }
 0x5db   : > { %v1851_v29 = vmul.f32 0.03125, %v1837_v13  ;;  %v1865_v57 = vmul.f32 %v3907_v27, %v3907_v27 }
 0x5dc   : > { %v3913_v30 = vsub.f32 %v1810_v58, %v1852_v12  ;;  %v1880_v31 = vsel %vm1546_vm4, %v1866_v28, 0.0  ;;  %3005 = vmatprep.subr.bf16.mxu0 %v3004_v55  ;;  %v3008_v58 = vpack.c.bf16 %v2707_v4, %v2706_v56 }
 0x5dd   : > { %v3916_v35 = vsub.f32 %v1805_v60, %v1851_v29  ;;  %1881 = vadd.xlane.f32.xlu1 %v1880_v31  ;;  %v1877_v32 = vsel %vm1546_vm4, %v1865_v57, 0.0  ;;  %3007 = vmatpush3.bf16.msra.mxu0 %v3004_v55 }
 0x5de   : > { %1878 = vadd.xlane.f32.xlu0 %v1877_v32  ;;  %v1846_v33 = vpop.xlane.xlu1 %1845  ;;  %v1868_v16 = vmul.f32 %v3913_v30, %v3913_v30  ;;  %3009 = vmatprep.subr.bf16.mxu0 %v3008_v58 }
 0x5df   : > { %v1854_v41 = vmul.f32 0.03125, %v1846_v33  ;;  %v1843_v34 = vpop.xlane.xlu0 %1842  ;;  %v1867_v38 = vmul.f32 %v3916_v35, %v3916_v35 }
 0x5e0   : > { %v1853_v39 = vmul.f32 0.03125, %v1843_v34  ;;  %v1886_v40 = vsel %vm1546_vm4, %v1868_v16, 0.0 }
 0x5e1   : > { %v3924_v42 = vsub.f32 %v1820_v0, %v1854_v41  ;;  %1887 = vadd.xlane.f32.xlu1 %v1886_v40  ;;  %v1883_v43 = vsel %vm1546_vm4, %v1867_v38, 0.0  ;;  %3011 = vmatpush3.bf16.msra.mxu0 %v3008_v58 }
 0x5e2   : > { %v3927_v44 = vsub.f32 %v1815_v2, %v1853_v39  ;;  %1884 = vadd.xlane.f32.xlu0 %v1883_v43 }
 0x5e3   : > { %v1870_v45 = vmul.f32 %v3924_v42, %v3924_v42 }
 0x5e4   : > { %v1869_v48 = vmul.f32 %v3927_v44, %v3927_v44 }
 0x5e5   : > { %v1892_v51 = vsel %vm1546_vm4, %v1870_v45, 0.0 }
 0x5e6   : > { %1893 = vadd.xlane.f32.xlu1 %v1892_v51  ;;  %v1889_v52 = vsel %vm1546_vm4, %v1869_v48, 0.0 }
 0x5e7   : > { %1890 = vadd.xlane.f32.xlu0 %v1889_v52 }
 0x665   : > { %v1876_v59 = vpop.xlane.xlu1 %1875 }
 0x666   : > { %v1896_v60 = vmul.f32 0.03125, %v1876_v59  ;;  %v1873_v61 = vpop.xlane.xlu0 %1872 }
 0x667   : > { %v1895_v62 = vmul.f32 0.03125, %v1873_v61 }
 0x668   : > { %v1904_v63 = vadd.f32 1e-05, %v1896_v60 }
 0x669   : > { %v1903_v0 = vadd.f32 1e-05, %v1895_v62 }
 0x66a   : > { %3129 = vrsqrt.f32 %v1904_v63  ;;  %v1882_v1 = vpop.xlane.xlu1 %1881 }
 0x66b   : > { %3131 = vrsqrt.f32 %v1903_v0  ;;  %v1898_v2 = vmul.f32 0.03125, %v1882_v1  ;;  %v1879_v9 = vpop.xlane.xlu0 %1878 }
 0x66c   : > { %v1897_v15 = vmul.f32 0.03125, %v1879_v9 }
 0x66d   : > { %v1906_v17 = vadd.f32 1e-05, %v1898_v2 }
 0x66e   : > { %v1905_v18 = vadd.f32 1e-05, %v1897_v15  ;;  %v1888_v19 = vpop.xlane.xlu1 %1887 }
 0x66f   : > { %3133 = vrsqrt.f32 %v1906_v17  ;;  %v1900_v3 = vmul.f32 0.03125, %v1888_v19  ;;  %v1885_v37 = vpop.xlane.xlu0 %1884 }
 0x670   : > { %3135 = vrsqrt.f32 %v1905_v18  ;;  %v1899_v20 = vmul.f32 0.03125, %v1885_v37 }
 0x671   : > { %v1908_v21 = vadd.f32 1e-05, %v1900_v3 }
 0x672   : > { %v1907_v22 = vadd.f32 1e-05, %v1899_v20 }
 0x673   : > { %3137 = vrsqrt.f32 %v1908_v21  ;;  %v1894_v23 = vpop.xlane.xlu1 %1893 }
 0x674   : > { %v3130_v24 = vpop.eup %3129  ;;  %3139 = vrsqrt.f32 %v1907_v22  ;;  %v1902_v25 = vmul.f32 0.03125, %v1894_v23  ;;  %v1891_v46 = vpop.xlane.xlu0 %1890 }
 0x675   : > { %v3132_v47 = vpop.eup %3131  ;;  %v1920_v12 = vmul.f32 %v3130_v24, %v3895_v50  ;;  %v1901_v13 = vmul.f32 0.03125, %v1891_v46 }
 0x676   : > { %v1919_v28 = vmul.f32 %v3132_v47, %v3897_v36  ;;  %v1910_v29 = vadd.f32 1e-05, %v1902_v25 }
 0x677   : > { %v1932_v57 = vmul.f32 %v3731_v6, %v1920_v12  ;;  %v1909_v31 = vadd.f32 1e-05, %v1901_v13 }
 0x678   : > { %v1931_v32 = vmul.f32 %v3731_v6, %v1919_v28  ;;  %3141 = vrsqrt.f32 %v1910_v29 }
 0x679   : > { %v3134_v33 = vpop.eup %3133  ;;  %v1944_v16 = vadd.f32 %v3735_v7, %v1932_v57  ;;  %3143 = vrsqrt.f32 %v1909_v31 }
 0x67a   : > { %v3136_v41 = vpop.eup %3135  ;;  %v1943_v34 = vadd.f32 %v3735_v7, %v1931_v32  ;;  %v1922_v38 = vmul.f32 %v3134_v33, %v3904_v26 }
 0x67b   : > { %v1921_v50 = vmul.f32 %v3136_v41, %v3907_v27 }
 0x67c   : > { %3145 = vtanh.f32 %v1943_v34  ;;  %v1934_v36 = vmul.f32 %v3731_v6, %v1922_v38 }
 0x67d   : > { %v3138_v39 = vpop.eup %3137  ;;  %3147 = vtanh.f32 %v1944_v16  ;;  %v1933_v40 = vmul.f32 %v3731_v6, %v1921_v50 }
 0x67e   : > { %v3140_v43 = vpop.eup %3139  ;;  %v1946_v45 = vadd.f32 %v3735_v7, %v1934_v36  ;;  %v1924_v48 = vmul.f32 %v3138_v39, %v3913_v30 }
 0x67f   : > { %v1945_v51 = vadd.f32 %v3735_v7, %v1933_v40  ;;  %v1923_v52 = vmul.f32 %v3140_v43, %v3916_v35 }
 0x680   : > { %v1936_v26 = vmul.f32 %v3731_v6, %v1924_v48 }
 0x681   : > { %3149 = vtanh.f32 %v1945_v51  ;;  %v1935_v27 = vmul.f32 %v3731_v6, %v1923_v52 }
 0x682   : > { %v3142_v53 = vpop.eup %3141  ;;  %3151 = vtanh.f32 %v1946_v45  ;;  %v1948_v54 = vadd.f32 %v3735_v7, %v1936_v26 }
 0x683   : > { %v3144_v55 = vpop.eup %3143  ;;  %v1947_v56 = vadd.f32 %v3735_v7, %v1935_v27  ;;  %v1926_v4 = vmul.f32 %v3142_v53, %v3924_v42 }
 0x684   : > { %v1925_v30 = vmul.f32 %v3144_v55, %v3927_v44 }
 0x685   : > { %3153 = vtanh.f32 %v1947_v56  ;;  %v1938_v58 = vmul.f32 %v3731_v6, %v1926_v4 }
 0x686   : > { %v3146_v35 = vpop.eup %3145  ;;  %3155 = vtanh.f32 %v1948_v54  ;;  %v1937_v59 = vmul.f32 %v3731_v6, %v1925_v30 }
 0x687   : > { %v3148_v60 = vpop.eup %3147  ;;  %v1950_v61 = vadd.f32 %v3735_v7, %v1938_v58  ;;  %2928 = vmatprep.mubr.msk.f32.mxu0 %vm1546_vm4, %v3146_v35 }
 0x688   : > { %v1949_v62 = vadd.f32 %v3735_v7, %v1937_v59  ;;  %2929 = vmatmul.mubr.msk.f32.vlgmr.msra.gmra.mrb[18].mxu0 %vm1546_vm4, %v3148_v60  ;;  %v1969_v7 = vrot.slane %v3727_v5, %v3789_v49 }
 0x68a   : > { %3157 = vtanh.f32 %v1949_v62 }
 0x68b   : > { %v3150_v42 = vpop.eup %3149  ;;  %3159 = vtanh.f32 %v1950_v61 }
 0x68c   : > { %v3152_v44 = vpop.eup %3151  ;;  %2931 = vmatprep.mubr.msk.f32.mxu0 %vm1546_vm4, %v3150_v42 }
 0x68d   : > { %2932 = vmatmul.mubr.msk.f32.gmra.mrb[20].mxu0 %vm1546_vm4, %v3152_v44 }
 0x68f   : > { %v3154_v63 = vpop.eup %3153 }
 0x690   : > { %v3156_v0 = vpop.eup %3155  ;;  %2934 = vmatprep.mubr.msk.f32.mxu0 %vm1546_vm4, %v3154_v63 }
 0x691   : > { %2935 = vmatmul.mubr.msk.f32.gmra.mrb[22].mxu0 %vm1546_vm4, %v3156_v0 }
 0x694   : > { %v3158_v6 = vpop.eup %3157 }
 0x695   : > { %v3160_v1 = vpop.eup %3159  ;;  %2937 = vmatprep.mubr.msk.f32.mxu0 %vm1546_vm4, %v3158_v6 }
 0x696   : > { %2938 = vmatmul.mubr.msk.f32.gmra.mrb[24].mxu0 %vm1546_vm4, %v3160_v1 }
 0x75b   : > { %v2930_v2 = vpop.f32.mrb[18].mxu0 }
 0x75c   : > { %v2066_v9 = vadd.f32 %v2930_v2, %v1969_v7  ;;  %v2060_v15 = vpop.f32.mrb[19].mxu0 }
 0x75d   : > { %v2061_v17 = vadd.f32 %v2060_v15, %v1969_v7 }
 0x75e   : > { %v2102_v18 = vsel %vm1546_vm4, %v2066_v9, 0.0 }
 0x75f   : > { %2103 = vadd.xlane.f32.xlu1 %v2102_v18  ;;  %v2099_v19 = vsel %vm1546_vm4, %v2061_v17, 0.0 }
 0x760   : > { %v2933_v3 = vpop.f32.mrb[20].mxu0  ;;  %2100 = vadd.xlane.f32.xlu0 %v2099_v19  ;;  %v2717_v19 = vld [vmem:[%s4214_s5 + $0x40] sm:$0xff] }
 0x761   : > { %v2076_v37 = vadd.f32 %v2933_v3, %v1969_v7  ;;  %v2070_v20 = vpop.f32.mrb[21].mxu0  ;;  %v2718_v3 = vld [vmem:[%s4214_s5 + $0x48] sm:$0xff] }
 0x762   : > { %v2071_v21 = vadd.f32 %v2070_v20, %v1969_v7  ;;  %v2719_v20 = vld [vmem:[%s4214_s5 + $0x50] sm:$0xff] }
 0x763   : > { %v2108_v22 = vsel %vm1546_vm4, %v2076_v37, 0.0 }
 0x764   : > { %2109 = vadd.xlane.f32.xlu1 %v2108_v22  ;;  %v2936_v23 = vpop.f32.mrb[22].mxu0  ;;  %v2105_v5 = vsel %vm1546_vm4, %v2071_v21, 0.0 }
 0x765   : > { %v2086_v24 = vadd.f32 %v2936_v23, %v1969_v7  ;;  %2106 = vadd.xlane.f32.xlu0 %v2105_v5  ;;  %v2080_v25 = vpop.f32.mrb[23].mxu0 }
 0x766   : > { %v2081_v46 = vadd.f32 %v2080_v25, %v1969_v7 }
 0x767   : > { %v2114_v47 = vsel %vm1546_vm4, %v2086_v24, 0.0 }
 0x768   : > { %2115 = vadd.xlane.f32.xlu1 %v2114_v47  ;;  %v2111_v12 = vsel %vm1546_vm4, %v2081_v46, 0.0 }
 0x769   : > { %2112 = vadd.xlane.f32.xlu0 %v2111_v12  ;;  %v2939_v13 = vpop.f32.mrb[24].mxu0 }
 0x76a   : > { %v2096_v28 = vadd.f32 %v2939_v13, %v1969_v7  ;;  %v2090_v29 = vpop.f32.mrb[25].mxu0 }
 0x76b   : > { %v2091_v57 = vadd.f32 %v2090_v29, %v1969_v7 }
 0x76c   : > { %v2120_v31 = vsel %vm1546_vm4, %v2096_v28, 0.0 }
 0x76d   : > { %2121 = vadd.xlane.f32.xlu1 %v2120_v31  ;;  %v2117_v32 = vsel %vm1546_vm4, %v2091_v57, 0.0 }
 0x76e   : > { %2118 = vadd.xlane.f32.xlu0 %v2117_v32 }
 0x7ec   : > { %v2104_v33 = vpop.xlane.xlu1 %2103 }
 0x7ed   : > { %v2124_v16 = vmul.f32 0.03125, %v2104_v33  ;;  %v2101_v41 = vpop.xlane.xlu0 %2100 }
 0x7ee   : > { %v2123_v34 = vmul.f32 0.03125, %v2101_v41 }
 0x7ef   : > { %v3989_v38 = vsub.f32 %v2066_v9, %v2124_v16 }
 0x7f0   : > { %v3991_v50 = vsub.f32 %v2061_v17, %v2123_v34 }
 0x7f1   : > { %v2110_v36 = vpop.xlane.xlu1 %2109  ;;  %v2140_v39 = vmul.f32 %v3989_v38, %v3989_v38 }
 0x7f2   : > { %v2126_v40 = vmul.f32 0.03125, %v2110_v36  ;;  %v2107_v43 = vpop.xlane.xlu0 %2106  ;;  %v2139_v45 = vmul.f32 %v3991_v50, %v3991_v50 }
 0x7f3   : > { %v2125_v48 = vmul.f32 0.03125, %v2107_v43  ;;  %v2150_v51 = vsel %vm1546_vm4, %v2140_v39, 0.0 }
 0x7f4   : > { %v3998_v52 = vsub.f32 %v2076_v37, %v2126_v40  ;;  %2151 = vadd.xlane.f32.xlu1 %v2150_v51  ;;  %v2147_v26 = vsel %vm1546_vm4, %v2139_v45, 0.0  ;;  %v3012_v37 = vpack.c.bf16 %v2718_v3, %v2717_v19 }
 0x7f5   : > { %v4001_v27 = vsub.f32 %v2071_v21, %v2125_v48  ;;  %v2116_v53 = vpop.xlane.xlu1 %2115  ;;  %2148 = vadd.xlane.f32.xlu0 %v2147_v26  ;;  %v2720_v21 = vld [vmem:[%s4214_s5 + $0x58] sm:$0xff] }
 0x7f6   : > { %v2128_v54 = vmul.f32 0.03125, %v2116_v53  ;;  %v2113_v55 = vpop.xlane.xlu0 %2112  ;;  %v2142_v56 = vmul.f32 %v3998_v52, %v3998_v52  ;;  %3013 = vmatprep.subr.bf16.mxu1 %v3012_v37  ;;  %v3016_v22 = vpack.c.bf16 %v2720_v21, %v2719_v20 }
 0x7f7   : > { %v2127_v4 = vmul.f32 0.03125, %v2113_v55  ;;  %v2141_v30 = vmul.f32 %v4001_v27, %v4001_v27  ;;  %3015 = vmatpush3.bf16.msra.mxu1 %v3012_v37 }
 0x7f8   : > { %v4007_v58 = vsub.f32 %v2086_v24, %v2128_v54  ;;  %v2156_v35 = vsel %vm1546_vm4, %v2142_v56, 0.0  ;;  %3017 = vmatprep.subr.bf16.mxu1 %v3016_v22 }
 0x7f9   : > { %v4010_v59 = vsub.f32 %v2081_v46, %v2127_v4  ;;  %2157 = vadd.xlane.f32.xlu1 %v2156_v35  ;;  %v2153_v60 = vsel %vm1546_vm4, %v2141_v30, 0.0 }
 0x7fa   : > { %2154 = vadd.xlane.f32.xlu0 %v2153_v60  ;;  %v2122_v61 = vpop.xlane.xlu1 %2121  ;;  %v2144_v62 = vmul.f32 %v4007_v58, %v4007_v58 }
 0x7fb   : > { %v2130_v42 = vmul.f32 0.03125, %v2122_v61  ;;  %v2119_v44 = vpop.xlane.xlu0 %2118  ;;  %v2143_v63 = vmul.f32 %v4010_v59, %v4010_v59  ;;  %3019 = vmatpush3.bf16.msra.mxu1 %v3016_v22 }
 0x7fc   : > { %v2129_v0 = vmul.f32 0.03125, %v2119_v44  ;;  %v2162_v6 = vsel %vm1546_vm4, %v2144_v62, 0.0 }
 0x7fd   : > { %v4018_v1 = vsub.f32 %v2096_v28, %v2130_v42  ;;  %2163 = vadd.xlane.f32.xlu1 %v2162_v6  ;;  %v2159_v7 = vsel %vm1546_vm4, %v2143_v63, 0.0 }
 0x7fe   : > { %v4021_v2 = vsub.f32 %v2091_v57, %v2129_v0  ;;  %2160 = vadd.xlane.f32.xlu0 %v2159_v7 }
 0x7ff   : > { %v2146_v9 = vmul.f32 %v4018_v1, %v4018_v1 }
 0x800   : > { %v2145_v15 = vmul.f32 %v4021_v2, %v4021_v2 }
 0x801   : > { %v2168_v17 = vsel %vm1546_vm4, %v2146_v9, 0.0 }
 0x802   : > { %2169 = vadd.xlane.f32.xlu1 %v2168_v17  ;;  %v2165_v18 = vsel %vm1546_vm4, %v2145_v15, 0.0 }
 0x803   : > { %2166 = vadd.xlane.f32.xlu0 %v2165_v18 }
 0x881   : > { %v2152_v23 = vpop.xlane.xlu1 %2151 }
 0x882   : > { %v2172_v5 = vmul.f32 0.03125, %v2152_v23  ;;  %v2149_v24 = vpop.xlane.xlu0 %2148 }
 0x883   : > { %v2171_v25 = vmul.f32 0.03125, %v2149_v24 }
 0x884   : > { %v2180_v46 = vadd.f32 1e-05, %v2172_v5 }
 0x885   : > { %v2179_v47 = vadd.f32 1e-05, %v2171_v25 }
 0x886   : > { %3161 = vrsqrt.f32 %v2180_v46  ;;  %v2158_v12 = vpop.xlane.xlu1 %2157 }
 0x887   : > { %3163 = vrsqrt.f32 %v2179_v47  ;;  %v2174_v13 = vmul.f32 0.03125, %v2158_v12  ;;  %v2155_v28 = vpop.xlane.xlu0 %2154 }
 0x888   : > { %v2173_v29 = vmul.f32 0.03125, %v2155_v28 }
 0x889   : > { %v2182_v57 = vadd.f32 1e-05, %v2174_v13 }
 0x88a   : > { %v2181_v31 = vadd.f32 1e-05, %v2173_v29  ;;  %v2164_v32 = vpop.xlane.xlu1 %2163 }
 0x88b   : > { %3165 = vrsqrt.f32 %v2182_v57  ;;  %v2176_v33 = vmul.f32 0.03125, %v2164_v32  ;;  %v2161_v16 = vpop.xlane.xlu0 %2160 }
 0x88c   : > { %3167 = vrsqrt.f32 %v2181_v31  ;;  %v2175_v41 = vmul.f32 0.03125, %v2161_v16 }
 0x88d   : > { %v2184_v34 = vadd.f32 1e-05, %v2176_v33 }
 0x88e   : > { %v2183_v36 = vadd.f32 1e-05, %v2175_v41 }
 0x88f   : > { %3169 = vrsqrt.f32 %v2184_v34  ;;  %v2170_v39 = vpop.xlane.xlu1 %2169 }
 0x890   : > { %v3162_v40 = vpop.eup %3161  ;;  %3171 = vrsqrt.f32 %v2183_v36  ;;  %v2178_v43 = vmul.f32 0.03125, %v2170_v39  ;;  %v2167_v45 = vpop.xlane.xlu0 %2166 }
 0x891   : > { %v3164_v48 = vpop.eup %3163  ;;  %v2196_v51 = vmul.f32 %v3162_v40, %v3989_v38  ;;  %v2177_v26 = vmul.f32 0.03125, %v2167_v45 }
 0x892   : > { %v2195_v53 = vmul.f32 %v3164_v48, %v3991_v50  ;;  %v2186_v54 = vadd.f32 1e-05, %v2178_v43 }
 0x893   : > { %v2208_v55 = vmul.f32 %v3739_v8, %v2196_v51  ;;  %v2185_v56 = vadd.f32 1e-05, %v2177_v26 }
 0x894   : > { %v2207_v4 = vmul.f32 %v3739_v8, %v2195_v53  ;;  %3173 = vrsqrt.f32 %v2186_v54 }
 0x895   : > { %v3166_v30 = vpop.eup %3165  ;;  %v2220_v35 = vadd.f32 %v3747_v10, %v2208_v55  ;;  %3175 = vrsqrt.f32 %v2185_v56 }
 0x896   : > { %v3168_v60 = vpop.eup %3167  ;;  %v2219_v61 = vadd.f32 %v3747_v10, %v2207_v4  ;;  %v2198_v62 = vmul.f32 %v3166_v30, %v3998_v52 }
 0x897   : > { %v2197_v38 = vmul.f32 %v3168_v60, %v4001_v27 }
 0x898   : > { %3177 = vtanh.f32 %v2219_v61  ;;  %v2210_v50 = vmul.f32 %v3739_v8, %v2198_v62 }
 0x899   : > { %v3170_v42 = vpop.eup %3169  ;;  %3179 = vtanh.f32 %v2220_v35  ;;  %v2209_v44 = vmul.f32 %v3739_v8, %v2197_v38 }
 0x89a   : > { %v3172_v63 = vpop.eup %3171  ;;  %v2222_v0 = vadd.f32 %v3747_v10, %v2210_v50  ;;  %v2200_v6 = vmul.f32 %v3170_v42, %v4007_v58 }
 0x89b   : > { %v2221_v7 = vadd.f32 %v3747_v10, %v2209_v44  ;;  %v2199_v9 = vmul.f32 %v3172_v63, %v4010_v59 }
 0x89c   : > { %v2212_v52 = vmul.f32 %v3739_v8, %v2200_v6 }
 0x89d   : > { %3181 = vtanh.f32 %v2221_v7  ;;  %v2211_v27 = vmul.f32 %v3739_v8, %v2199_v9 }
 0x89e   : > { %v3174_v15 = vpop.eup %3173  ;;  %3183 = vtanh.f32 %v2222_v0  ;;  %v2224_v17 = vadd.f32 %v3747_v10, %v2212_v52 }
 0x89f   : > { %v3176_v18 = vpop.eup %3175  ;;  %v2223_v19 = vadd.f32 %v3747_v10, %v2211_v27  ;;  %v2202_v3 = vmul.f32 %v3174_v15, %v4018_v1 }
 0x8a0   : > { %v2201_v58 = vmul.f32 %v3176_v18, %v4021_v2 }
 0x8a1   : > { %3185 = vtanh.f32 %v2223_v19  ;;  %v2214_v37 = vmul.f32 %v3739_v8, %v2202_v3 }
 0x8a2   : > { %v3178_v59 = vpop.eup %3177  ;;  %3187 = vtanh.f32 %v2224_v17  ;;  %v2213_v20 = vmul.f32 %v3739_v8, %v2201_v58 }
 0x8a3   : > { %v3180_v21 = vpop.eup %3179  ;;  %v2226_v22 = vadd.f32 %v3747_v10, %v2214_v37  ;;  %2948 = vmatprep.mubr.msk.f32.mxu1 %vm1546_vm4, %v3178_v59 }
 0x8a4   : > { %v2225_v23 = vadd.f32 %v3747_v10, %v2213_v20  ;;  %2949 = vmatmul.mubr.msk.f32.vlgmr.msra.gmra.mrb[16].mxu1 %vm1546_vm4, %v3180_v21  ;;  %v3225_v10 = vld [vmem:[%s4215_s6 + $0xc] sm:$0x7] }
 0x8a5   : > { %v2245_v46 = vrot.slane %v3225_v10, %v3789_v49 }
 0x8a6   : > { %3189 = vtanh.f32 %v2225_v23 }
 0x8a7   : > { %v3182_v1 = vpop.eup %3181  ;;  %3191 = vtanh.f32 %v2226_v22 }
 0x8a8   : > { %v3184_v2 = vpop.eup %3183  ;;  %2951 = vmatprep.mubr.msk.f32.mxu1 %vm1546_vm4, %v3182_v1 }
 0x8a9   : > { %2952 = vmatmul.mubr.msk.f32.gmra.mrb[18].mxu1 %vm1546_vm4, %v3184_v2 }
 0x8ab   : > { %v3186_v5 = vpop.eup %3185 }
 0x8ac   : > { %v3188_v24 = vpop.eup %3187  ;;  %2954 = vmatprep.mubr.msk.f32.mxu1 %vm1546_vm4, %v3186_v5 }
 0x8ad   : > { %2955 = vmatmul.mubr.msk.f32.gmra.mrb[20].mxu1 %vm1546_vm4, %v3188_v24 }
 0x8b0   : > { %v3190_v8 = vpop.eup %3189 }
 0x8b1   : > { %v3192_v25 = vpop.eup %3191  ;;  %2957 = vmatprep.mubr.msk.f32.mxu1 %vm1546_vm4, %v3190_v8 }
 0x8b2   : > { %2958 = vmatmul.mubr.msk.f32.gmra.mrb[22].mxu1 %vm1546_vm4, %v3192_v25 }
 0x977   : > { %v2950_v47 = vpop.f32.mrb[16].mxu1 }
 0x978   : > { %v2342_v12 = vadd.f32 %v2950_v47, %v2245_v46  ;;  %v2336_v13 = vpop.f32.mrb[17].mxu1 }
 0x979   : > { %v2337_v28 = vadd.f32 %v2336_v13, %v2245_v46 }
 0x97a   : > { %v2378_v29 = vsel %vm1546_vm4, %v2342_v12, 0.0 }
 0x97b   : > { %2379 = vadd.xlane.f32.xlu1 %v2378_v29  ;;  %v2375_v57 = vsel %vm1546_vm4, %v2337_v28, 0.0 }
 0x97c   : > { %v2953_v31 = vpop.f32.mrb[18].mxu1  ;;  %2376 = vadd.xlane.f32.xlu0 %v2375_v57 }
 0x97d   : > { %v2352_v32 = vadd.f32 %v2953_v31, %v2245_v46  ;;  %v2346_v33 = vpop.f32.mrb[19].mxu1 }
 0x97e   : > { %v2347_v16 = vadd.f32 %v2346_v33, %v2245_v46 }
 0x97f   : > { %v2384_v41 = vsel %vm1546_vm4, %v2352_v32, 0.0 }
 0x980   : > { %2385 = vadd.xlane.f32.xlu1 %v2384_v41  ;;  %v2956_v34 = vpop.f32.mrb[20].mxu1  ;;  %v2381_v49 = vsel %vm1546_vm4, %v2347_v16, 0.0 }
 0x981   : > { %v2362_v36 = vadd.f32 %v2956_v34, %v2245_v46  ;;  %2382 = vadd.xlane.f32.xlu0 %v2381_v49  ;;  %v2356_v39 = vpop.f32.mrb[21].mxu1 }
 0x982   : > { %v2357_v40 = vadd.f32 %v2356_v39, %v2245_v46 }
 0x983   : > { %v2390_v43 = vsel %vm1546_vm4, %v2362_v36, 0.0 }
 0x984   : > { %2391 = vadd.xlane.f32.xlu1 %v2390_v43  ;;  %v2387_v45 = vsel %vm1546_vm4, %v2357_v40, 0.0 }
 0x985   : > { %2388 = vadd.xlane.f32.xlu0 %v2387_v45  ;;  %v2959_v48 = vpop.f32.mrb[22].mxu1 }
 0x986   : > { %v2372_v51 = vadd.f32 %v2959_v48, %v2245_v46  ;;  %v2366_v26 = vpop.f32.mrb[23].mxu1 }
 0x987   : > { %v2367_v53 = vadd.f32 %v2366_v26, %v2245_v46 }
 0x988   : > { %v2396_v54 = vsel %vm1546_vm4, %v2372_v51, 0.0 }
 0x989   : > { %2397 = vadd.xlane.f32.xlu1 %v2396_v54  ;;  %v2393_v55 = vsel %vm1546_vm4, %v2367_v53, 0.0 }
 0x98a   : > { %2394 = vadd.xlane.f32.xlu0 %v2393_v55 }
 0xa08   : > { %v2380_v56 = vpop.xlane.xlu1 %2379 }
 0xa09   : > { %v2400_v4 = vmul.f32 0.03125, %v2380_v56  ;;  %v2377_v30 = vpop.xlane.xlu0 %2376 }
 0xa0a   : > { %v2399_v35 = vmul.f32 0.03125, %v2377_v30 }
 0xa0b   : > { %v4085_v60 = vsub.f32 %v2342_v12, %v2400_v4 }
 0xa0c   : > { %v4087_v61 = vsub.f32 %v2337_v28, %v2399_v35 }
 0xa0d   : > { %v2386_v62 = vpop.xlane.xlu1 %2385  ;;  %v2416_v38 = vmul.f32 %v4085_v60, %v4085_v60 }
 0xa0e   : > { %v2402_v50 = vmul.f32 0.03125, %v2386_v62  ;;  %v2383_v42 = vpop.xlane.xlu0 %2382  ;;  %v2415_v44 = vmul.f32 %v4087_v61, %v4087_v61 }
 0xa0f   : > { %v2401_v63 = vmul.f32 0.03125, %v2383_v42  ;;  %v2426_v0 = vsel %vm1546_vm4, %v2416_v38, 0.0 }
 0xa10   : > { %v4094_v6 = vsub.f32 %v2352_v32, %v2402_v50  ;;  %2427 = vadd.xlane.f32.xlu1 %v2426_v0  ;;  %v2423_v7 = vsel %vm1546_vm4, %v2415_v44, 0.0 }
 0xa11   : > { %v4097_v9 = vsub.f32 %v2347_v16, %v2401_v63  ;;  %v2392_v52 = vpop.xlane.xlu1 %2391  ;;  %2424 = vadd.xlane.f32.xlu0 %v2423_v7 }
 0xa12   : > { %v2404_v27 = vmul.f32 0.03125, %v2392_v52  ;;  %v2389_v15 = vpop.xlane.xlu0 %2388  ;;  %v2418_v17 = vmul.f32 %v4094_v6, %v4094_v6 }
 0xa13   : > { %v2403_v18 = vmul.f32 0.03125, %v2389_v15  ;;  %v2417_v19 = vmul.f32 %v4097_v9, %v4097_v9 }
 0xa14   : > { %v4103_v3 = vsub.f32 %v2362_v36, %v2404_v27  ;;  %v2432_v58 = vsel %vm1546_vm4, %v2418_v17, 0.0 }
 0xa15   : > { %v4106_v37 = vsub.f32 %v2357_v40, %v2403_v18  ;;  %2433 = vadd.xlane.f32.xlu1 %v2432_v58  ;;  %v2429_v59 = vsel %vm1546_vm4, %v2417_v19, 0.0 }
 0xa16   : > { %2430 = vadd.xlane.f32.xlu0 %v2429_v59  ;;  %v2398_v20 = vpop.xlane.xlu1 %2397  ;;  %v2420_v21 = vmul.f32 %v4103_v3, %v4103_v3 }
 0xa17   : > { %v2406_v22 = vmul.f32 0.03125, %v2398_v20  ;;  %v2395_v23 = vpop.xlane.xlu0 %2394  ;;  %v2419_v1 = vmul.f32 %v4106_v37, %v4106_v37 }
 0xa18   : > { %v2405_v2 = vmul.f32 0.03125, %v2395_v23  ;;  %v2438_v5 = vsel %vm1546_vm4, %v2420_v21, 0.0 }
 0xa19   : > { %v4114_v24 = vsub.f32 %v2372_v51, %v2406_v22  ;;  %2439 = vadd.xlane.f32.xlu1 %v2438_v5  ;;  %v2435_v8 = vsel %vm1546_vm4, %v2419_v1, 0.0 }
 0xa1a   : > { %v4117_v25 = vsub.f32 %v2367_v53, %v2405_v2  ;;  %2436 = vadd.xlane.f32.xlu0 %v2435_v8 }
 0xa1b   : > { %v2422_v10 = vmul.f32 %v4114_v24, %v4114_v24 }
 0xa1c   : > { %v2421_v46 = vmul.f32 %v4117_v25, %v4117_v25 }
 0xa1d   : > { %v2444_v47 = vsel %vm1546_vm4, %v2422_v10, 0.0 }
 0xa1e   : > { %2445 = vadd.xlane.f32.xlu1 %v2444_v47  ;;  %v2441_v12 = vsel %vm1546_vm4, %v2421_v46, 0.0 }
 0xa1f   : > { %2442 = vadd.xlane.f32.xlu0 %v2441_v12 }
 0xa9d   : > { %v2428_v13 = vpop.xlane.xlu1 %2427 }
 0xa9e   : > { %v2448_v28 = vmul.f32 0.03125, %v2428_v13  ;;  %v2425_v29 = vpop.xlane.xlu0 %2424 }
 0xa9f   : > { %v2447_v57 = vmul.f32 0.03125, %v2425_v29 }
 0xaa0   : > { %v2456_v31 = vadd.f32 1e-05, %v2448_v28 }
 0xaa1   : > { %v2455_v32 = vadd.f32 1e-05, %v2447_v57 }
 0xaa2   : > { %3193 = vrsqrt.f32 %v2456_v31  ;;  %v2434_v33 = vpop.xlane.xlu1 %2433 }
 0xaa3   : > { %3195 = vrsqrt.f32 %v2455_v32  ;;  %v2450_v16 = vmul.f32 0.03125, %v2434_v33  ;;  %v2431_v41 = vpop.xlane.xlu0 %2430 }
 0xaa4   : > { %v2449_v34 = vmul.f32 0.03125, %v2431_v41 }
 0xaa5   : > { %v2458_v49 = vadd.f32 1e-05, %v2450_v16 }
 0xaa6   : > { %v2457_v36 = vadd.f32 1e-05, %v2449_v34  ;;  %v2440_v39 = vpop.xlane.xlu1 %2439 }
 0xaa7   : > { %3197 = vrsqrt.f32 %v2458_v49  ;;  %v2452_v40 = vmul.f32 0.03125, %v2440_v39  ;;  %v2437_v43 = vpop.xlane.xlu0 %2436 }
 0xaa8   : > { %3199 = vrsqrt.f32 %v2457_v36  ;;  %v2451_v45 = vmul.f32 0.03125, %v2437_v43 }
 0xaa9   : > { %v2460_v48 = vadd.f32 1e-05, %v2452_v40 }
 0xaaa   : > { %v2459_v51 = vadd.f32 1e-05, %v2451_v45 }
 0xaab   : > { %3201 = vrsqrt.f32 %v2460_v48  ;;  %v2446_v26 = vpop.xlane.xlu1 %2445 }
 0xaac   : > { %v3194_v53 = vpop.eup %3193  ;;  %3203 = vrsqrt.f32 %v2459_v51  ;;  %v2454_v54 = vmul.f32 0.03125, %v2446_v26  ;;  %v2443_v55 = vpop.xlane.xlu0 %2442 }
 0xaad   : > { %v3196_v56 = vpop.eup %3195  ;;  %v2472_v4 = vmul.f32 %v3194_v53, %v4085_v60  ;;  %v2453_v30 = vmul.f32 0.03125, %v2443_v55 }
 0xaae   : > { %v2471_v35 = vmul.f32 %v3196_v56, %v4087_v61  ;;  %v2462_v62 = vadd.f32 1e-05, %v2454_v54 }
 0xaaf   : > { %v2484_v38 = vmul.f32 %v3750_v11, %v2472_v4  ;;  %v2461_v50 = vadd.f32 1e-05, %v2453_v30 }
 0xab0   : > { %v2483_v42 = vmul.f32 %v3750_v11, %v2471_v35  ;;  %3205 = vrsqrt.f32 %v2462_v62 }
 0xab1   : > { %v3198_v44 = vpop.eup %3197  ;;  %v2496_v63 = vadd.f32 %v3753_v14, %v2484_v38  ;;  %3207 = vrsqrt.f32 %v2461_v50 }
 0xab2   : > { %v3200_v0 = vpop.eup %3199  ;;  %v2495_v7 = vadd.f32 %v3753_v14, %v2483_v42  ;;  %v2474_v60 = vmul.f32 %v3198_v44, %v4094_v6 }
 0xab3   : > { %3209 = vtanh.f32 %v2496_v63  ;;  %v2473_v61 = vmul.f32 %v3200_v0, %v4097_v9 }
 0xab4   : > { %3211 = vtanh.f32 %v2495_v7  ;;  %v2486_v52 = vmul.f32 %v3750_v11, %v2474_v60 }
 0xab5   : > { %v3202_v27 = vpop.eup %3201  ;;  %v2485_v15 = vmul.f32 %v3750_v11, %v2473_v61 }
 0xab6   : > { %v3204_v17 = vpop.eup %3203  ;;  %v2498_v18 = vadd.f32 %v3753_v14, %v2486_v52  ;;  %v2476_v19 = vmul.f32 %v3202_v27, %v4103_v3 }
 0xab7   : > { %v2497_v58 = vadd.f32 %v3753_v14, %v2485_v15  ;;  %v2475_v59 = vmul.f32 %v3204_v17, %v4106_v37 }
 0xab8   : > { %3213 = vtanh.f32 %v2498_v18  ;;  %v2488_v6 = vmul.f32 %v3750_v11, %v2476_v19 }
 0xab9   : > { %3215 = vtanh.f32 %v2497_v58  ;;  %v2487_v9 = vmul.f32 %v3750_v11, %v2475_v59 }
 0xaba   : > { %v3206_v20 = vpop.eup %3205  ;;  %v2500_v21 = vadd.f32 %v3753_v14, %v2488_v6 }
 0xabb   : > { %v3208_v22 = vpop.eup %3207  ;;  %v2499_v23 = vadd.f32 %v3753_v14, %v2487_v9  ;;  %v2478_v1 = vmul.f32 %v3206_v20, %v4114_v24 }
 0xabc   : > { %3217 = vtanh.f32 %v2500_v21  ;;  %v2477_v3 = vmul.f32 %v3208_v22, %v4117_v25 }
 0xabd   : > { %v3210_v2 = vpop.eup %3209  ;;  %3219 = vtanh.f32 %v2499_v23  ;;  %v2490_v37 = vmul.f32 %v3750_v11, %v2478_v1 }
 0xabe   : > { %v3212_v5 = vpop.eup %3211  ;;  %v2489_v8 = vmul.f32 %v3750_v11, %v2477_v3  ;;  %2512 = vst.msk [vmem:[%s359_s12 + $0x8] sm:$0xff] %vm1546_vm4, %v3210_v2 }
 0xabf   : > { %v2502_v10 = vadd.f32 %v3753_v14, %v2490_v37  ;;  %2511 = vst.msk [vmem:[%s359_s12] sm:$0xff] %vm1546_vm4, %v3212_v5 }
 0xac0   : > { %v2501_v24 = vadd.f32 %v3753_v14, %v2489_v8 }
 0xac1   : > { %3221 = vtanh.f32 %v2502_v10 }
 0xac2   : > { %v3214_v46 = vpop.eup %3213  ;;  %3223 = vtanh.f32 %v2501_v24 }
 0xac3   : > { %v3216_v25 = vpop.eup %3215  ;;  %2514 = vst.msk [vmem:[%s359_s12 + $0x18] sm:$0xff] %vm1546_vm4, %v3214_v46 }
 0xac4   : > { %2513 = vst.msk [vmem:[%s359_s12 + $0x10] sm:$0xff] %vm1546_vm4, %v3216_v25 }
 0xac6   : > { %v3218_v11 = vpop.eup %3217 }
 0xac7   : > { %v3220_v47 = vpop.eup %3219  ;;  %2516 = vst.msk [vmem:[%s359_s12 + $0x28] sm:$0xff] %vm1546_vm4, %v3218_v11 }
 0xac8   : > { %2515 = vst.msk [vmem:[%s359_s12 + $0x20] sm:$0xff] %vm1546_vm4, %v3220_v47 }
 0xacb   : > { %v3222_v14 = vpop.eup %3221 }
 0xacc   : > { %v3224_v12 = vpop.eup %3223  ;;  %2518 = vst.msk [vmem:[%s359_s12 + $0x38] sm:$0xff] %vm1546_vm4, %v3222_v14 }
 0xacd   : > { %2517 = vst.msk [vmem:[%s359_s12 + $0x30] sm:$0xff] %vm1546_vm4, %v3224_v12 }
 0xace   : > { %3325 = shalt.err (!%p3322_p13)
}
 0xacf   : > { %s3326_s17 = scalar_lea.hbm %s4160_s20, 1024  ;;  %s3330_s19 = scalar_lea.hbm %s4216_s7, 2048 }
 0xad0   : > { %p3327_p6 = scmp.ne.s32.totalorder %s4160_s20, %s3326_s17  ;;  %p3331_p5 = scmp.lt.u32.totalorder %s4160_s20, %s4216_s7 }
 0xad1   : > { %p3332_p8 = scmp.lt.u32.totalorder %s3330_s19, %s3326_s17  ;;  %p3334_p0 = scmp.lt.u32.totalorder %s3326_s17, %s4160_s20 }
 0xad2   : > { %p3328_p10 = pnand %p3327_p6, %p4230_p1 }
 0xad3   : > { %p3333_p11 = por %p3332_p8, %p3331_p5 }
 0xad4   : > { %p3329_p4 = pneg %p3328_p10 }
 0xad5   : > { %p3335_p3 = por %p3334_p0, %p3333_p11 }
 0xad7   : > { %p3336_p7 = pnand %p3335_p3, %p3329_p4 }
 0xad9   : > { %3339 = shalt.err (!%p3336_p7)
}
 0xada   : > { %s3397_s11 = smov 128  }
 0xadb   : > { %3030 = dma.vmem_to_hbm [thread:$0]  (%p4230_p1), %s4162_s16, 1024, %s4160_s20, %s2520_s28, %s3397_s11, %s3397_s11, %s3395_s14  }
 0xadc PF: > { %s2549_s22 = sand.u32 1, %s3370_s24   ;;  %p4231_p9 = scmp.ne.s32.totalorder %s4221_s8, 0 }
 0xadd   : > { %p4232_p12 = scmp.ge.s32.totalorder %s3382_s27, 2  ;;  %s2550_s23 = scalar_lea.sflag [#allocation4], %s2549_s22 }
 0xadf   : > { %p3044_p2 = pnand %p4232_p12, %p4231_p9 }
 0xae1   : > { %3365 = dma.done.wait (!%p3044_p2), %s2550_s23, 1024  }
 0xae2   : > { %3367 = vsyncadd (!%p3044_p2), %s2550_s23, 4294966272  ;;  %p21_p13 = scmp.ge.s32.totalorder %s3548_s29, 4   ;;  %s4233_s24 = smov %s3374_s25 }
 0xae3   : > { %s4234_s25 = smov %s3378_s26  ;;  %s4235_s26 = smov %s3564_s15 }
 0xae4   : > { %s4236_s27 = smov %s3548_s29  ;;  %23 = sbr.rel (!%p21_p13) target bundleno = 6 (0x6), region = 112 }
 0xaeb   :  { %2555 = vsyncpa [#allocation3], 1 }
 0xaec   :  { %2557 = vsyncpa [#allocation3 + $0x1], 1 }
 0xaed   :  { %2558 = vsyncpa [#allocation6], 1 }
 0xaee   :  { %2559 = vsyncpa [#allocation4], 1 }
 0xaef   :  { %2561 = vsyncpa [#allocation4 + $0x1], 1 }

</bundles_post_ra>
